<compile_context>
chip_gen: v7x
topology: tpu7x:2x2x1
jax: 0.10.0
libtpu: 0.0.40
codegen_flags: <defaults>
</compile_context>

<pallas_src>
import functools

import jax
import jax.numpy as jnp
from jax.experimental import pallas as pl
from jax.experimental.pallas import tpu as pltpu


def _attn_decoder_step_kernel(emb_ref, s0_ref, enc_ref,
                              wa_ref, v_ref, wg_ref, bg_ref, wo_ref, bo_ref,
                              pred_ref, h_ref, *, e, he, hd):
    """One decode step for one batch block; grid = (batch_blocks, T).

    emb   : (bb, E)        embedded token for this timestep / batch block
    s0    : (bb, Hd)       initial decoder hidden state
    enc   : (bb, S, He)    encoder outputs
    wa    : (Hd+He, Ha)    attention weight^T, rows [acting on h | acting on enc]
    v     : (1, Ha)        attention scoring vector
    wg    : (E+He+Hd, 3Hd) rows [W_ih^T(emb) | W_ih^T(ctx) | W_hh^T], gate order r,z,n
    bg    : (2, 3Hd)       rows [b_ih | b_hh]
    wo    : (Hd+He+E, V)   fc_out weight^T, rows [fc(h) | fc(c) | fc(emb)];  bo : (1, V)

    Weights have constant index_maps -> DMA'd into VMEM once, resident for the
    whole grid.  The recurrent hidden state is carried in the resident h output
    block: initialised from s0 at t == 0, re-read / overwritten every step, and
    written back to HBM only when the batch block changes (after its last step).
    """
    t = pl.program_id(1)
    bb, s_len, _ = enc_ref.shape

    # ---- carry: initialise hidden state from s0 on the first timestep -------
    @pl.when(t == 0)
    def _():
        h_ref[...] = s0_ref[...]

    emb = emb_ref[...]                                                 # (bb, E)
    h_prev = h_ref[...]                                                # (bb, Hd)
    enc = enc_ref[...]                                                 # (bb, S, He)

    # ---- Bahdanau attention: softmax_s( v . tanh([h, enc] @ Wa^T) ) ---------
    proj_s = jnp.dot(h_prev, wa_ref[:hd, :],
                     preferred_element_type=jnp.float32)               # (bb, Ha)
    proj_e = jnp.dot(enc.reshape(bb * s_len, he), wa_ref[hd:, :],
                     preferred_element_type=jnp.float32)               # (bb*S, Ha)
    energy = jnp.tanh(proj_e.reshape(bb, s_len, -1) + proj_s[:, None, :])
    # v-scoring kept on VPU/XLU: at Ha=32 the MXU form needs a (bb*S,1)->(bb,S)
    # relayout that costs more than the 32-lane reduce it would replace.
    scores = jnp.sum(energy * v_ref[...][None], axis=-1)               # (bb, S)
    scores = scores - jnp.max(scores, axis=-1, keepdims=True)
    ex = jnp.exp(scores)
    inv = pl.reciprocal(jnp.sum(ex, axis=-1, keepdims=True), approx=True)  # EUP slot
    a = ex * inv                                                       # (bb, S)

    # ---- context vector c = a @ enc (weighted sum over source positions) ----
    # TODO(synk): route through a per-batch MXU dot_general if S grows well past 8.
    c = jnp.sum(a[:, :, None] * enc, axis=1)                           # (bb, He)

    # ---- one GRU step on x=[emb, c], hidden h_prev (PyTorch gate order r,z,n)
    gi = (jnp.dot(emb, wg_ref[:e, :], preferred_element_type=jnp.float32)
          + jnp.dot(c, wg_ref[e:e + he, :], preferred_element_type=jnp.float32)
          + bg_ref[0:1, :])                                            # (bb, 3Hd)
    gh = (jnp.dot(h_prev, wg_ref[e + he:, :], preferred_element_type=jnp.float32)
          + bg_ref[1:2, :])                                            # (bb, 3Hd)
    r = jax.nn.sigmoid(gi[:, 0 * hd:1 * hd] + gh[:, 0 * hd:1 * hd])
    z = jax.nn.sigmoid(gi[:, 1 * hd:2 * hd] + gh[:, 1 * hd:2 * hd])
    n = jnp.tanh(gi[:, 2 * hd:3 * hd] + r * gh[:, 2 * hd:3 * hd])
    h_new = (1.0 - z) * n + z * h_prev                                 # (bb, Hd)

    # ---- pred = fc_out([h_new, c, emb]) as summed partial dots (no concat) --
    pred = (jnp.dot(h_new, wo_ref[:hd, :], preferred_element_type=jnp.float32)
            + jnp.dot(c, wo_ref[hd:hd + he, :], preferred_element_type=jnp.float32)
            + jnp.dot(emb, wo_ref[hd + he:, :], preferred_element_type=jnp.float32)
            + bo_ref[...])                                             # (bb, V)

    pred_ref[...] = pred.astype(pred_ref.dtype)
    h_ref[...] = h_new.astype(h_ref.dtype)


def _resident_spec(shape):
    """Whole-array block with a constant index_map -> stays resident in VMEM."""
    nd = len(shape)
    return pl.BlockSpec(shape, lambda b, t, _nd=nd: (0,) * _nd)


def attention_decoder_decode(emb_seq, s0, enc,
                             attn_w, v_row, gru_w, gru_b, out_w, out_b,
                             *, batch_block=8):
    """Fused (teacher-forced) decode over a whole token sequence.

    emb_seq (T, B, E) embedded tokens, s0 (B, Hd), enc (B, S, He)
      -> pred_seq (T, B, V), h_final (B, Hd)
    Semantically identical to T sequential applications of the PyTorch forward.
    """
    T, B, E = emb_seq.shape
    _, S, He = enc.shape
    Hd = s0.shape[-1]
    V = out_b.shape[-1]
    Ha = v_row.shape[-1]
    bb = batch_block if (B % batch_block == 0) else B
    nb = B // bb

    kernel = functools.partial(_attn_decoder_step_kernel, e=E, he=He, hd=Hd)

    grid_spec = pltpu.PrefetchScalarGridSpec(
        num_scalar_prefetch=0,
        grid=(nb, T),
        in_specs=[
            pl.BlockSpec((None, bb, E), lambda b, t: (t, b, 0)),   # emb per step
            pl.BlockSpec((bb, Hd), lambda b, t: (b, 0)),           # s0 per batch block
            pl.BlockSpec((bb, S, He), lambda b, t: (b, 0, 0)),     # encoder outputs
            _resident_spec((Hd + He, Ha)),                         # attn_w (resident)
            _resident_spec((1, Ha)),                               # v_row  (resident)
            _resident_spec((E + He + Hd, 3 * Hd)),                 # gru_w  (resident)
            _resident_spec((2, 3 * Hd)),                           # gru_b  (resident)
            _resident_spec((Hd + He + E, V)),                      # out_w  (resident)
            _resident_spec((1, V)),                                # out_b  (resident)
        ],
        out_specs=(
            pl.BlockSpec((None, bb, V), lambda b, t: (t, b, 0)),   # pred per step
            pl.BlockSpec((bb, Hd), lambda b, t: (b, 0)),           # h carry / final
        ),
    )

    pred_seq, h_final = pl.pallas_call(
        kernel,
        out_shape=(jax.ShapeDtypeStruct((T, B, V), jnp.float32),
                   jax.ShapeDtypeStruct((B, Hd), jnp.float32)),
        grid_spec=grid_spec,
        compiler_params=pltpu.CompilerParams(
            dimension_semantics=("parallel", "arbitrary")),
    )(emb_seq, s0, enc, attn_w, v_row, gru_w, gru_b, out_w, out_b)
    return pred_seq, h_final


class AttentionDecoderPallas:
    """Mirror of the PyTorch Attention_decoder:
    nn.Embedding + (injected) Bahdanau attention + batch_first single-step GRU + fc_out."""

    def __init__(self, output_dim, embedding_dim, encoder_hidden_dim,
                 decoder_hidden_dim, key):
        V, E, He, Hd = output_dim, embedding_dim, encoder_hidden_dim, decoder_hidden_dim
        ks = jax.random.split(key, 9)
        sg = 1.0 / jnp.sqrt(Hd)
        # nn.Embedding(output_dim, embedding_dim)
        self.embedding = jax.random.normal(ks[0], (V, E), jnp.float32)
        # Bahdanau attention: attn = Linear(Hd + He, Hd, bias=False), v = Linear(Hd, 1, bias=False)
        self.w_attn = jax.random.uniform(ks[1], (Hd, Hd + He), jnp.float32, -sg, sg)
        self.v_attn = jax.random.uniform(ks[2], (1, Hd), jnp.float32, -sg, sg)
        # nn.GRU(encoder_hidden_dim + embedding_dim, decoder_hidden_dim, batch_first=True)
        self.w_ih = jax.random.uniform(ks[3], (3 * Hd, E + He), jnp.float32, -sg, sg)
        self.w_hh = jax.random.uniform(ks[4], (3 * Hd, Hd), jnp.float32, -sg, sg)
        self.b_ih = jax.random.uniform(ks[5], (3 * Hd,), jnp.float32, -sg, sg)
        self.b_hh = jax.random.uniform(ks[6], (3 * Hd,), jnp.float32, -sg, sg)
        # nn.Linear(encoder_hidden_dim + decoder_hidden_dim + embedding_dim, output_dim)
        so = 1.0 / jnp.sqrt(Hd + He + E)
        self.w_out = jax.random.uniform(ks[7], (V, Hd + He + E), jnp.float32, -so, so)
        self.b_out = jax.random.uniform(ks[8], (V,), jnp.float32, -so, so)
        self.dims = (V, E, He, Hd)

        # Perf: pre-transpose / pack weights ONCE (hoisted out of the decode path).
        self.attn_w = self.w_attn.T                                  # (Hd+He, Ha)
        self.v_row = self.v_attn                                     # (1, Ha)
        self.gru_w = jnp.concatenate([self.w_ih.T, self.w_hh.T], 0)  # (E+He+Hd, 3Hd)
        self.gru_b = jnp.stack([self.b_ih, self.b_hh], axis=0)       # (2, 3Hd)
        self.out_w = self.w_out.T                                    # (Hd+He+E, V)
        self.out_b = self.b_out.reshape(1, -1)                       # (1, V)
        # TODO(synk): for large vocabularies cast the matmul-input slabs to bf16
        # (f32 accumulation stays) to halve resident VMEM / DMA bytes on v6e/v7x.

    def decode(self, token_ids, s0, encoder_output):
        """token_ids (T, B) int32 -> (pred_seq (T, B, V), h_final (B, Hd)).
        One fused pallas_call for the whole sequence (weights resident in VMEM)."""
        # Embedding lookup for all T tokens at once, hoisted out of the per-step path.
        # TODO(synk): move the gather in-kernel (scalar-prefetched ids + row DMA) for
        # production vocab sizes where the embedding table no longer fits VMEM.
        emb_seq = jnp.take(self.embedding, token_ids, axis=0).astype(jnp.float32)
        return attention_decoder_decode(
            emb_seq, s0.astype(jnp.float32), encoder_output.astype(jnp.float32),
            self.attn_w, self.v_row, self.gru_w, self.gru_b, self.out_w, self.out_b)

    def __call__(self, decoder_input, s, encoder_output):
        # Single decode step, exactly the PyTorch module forward:
        # decoder_input: (B,) int32; s: (B, Hd); encoder_output: (B, S, He)
        pred_seq, h_new = self.decode(decoder_input[None, :], s, encoder_output)
        return pred_seq[0], h_new                                    # (B, V), (B, Hd)


# ----------------------------- pure-JAX reference -----------------------------
def _reference_step(m, decoder_input, s, encoder_output):
    """Follows the PyTorch forward exactly (concat forms, f32 exact division)."""
    V, E, He, Hd = m.dims
    B, S, _ = encoder_output.shape
    emb = jnp.take(m.embedding, decoder_input, axis=0)                    # (B, E)
    s_rep = jnp.broadcast_to(s[:, None, :], (B, S, Hd))
    energy = jnp.tanh(jnp.concatenate([s_rep, encoder_output], axis=-1) @ m.w_attn.T)
    scores = jnp.squeeze(energy @ m.v_attn.T, axis=-1)                    # (B, S)
    a = jax.nn.softmax(scores, axis=-1)
    c = jnp.einsum('bs,bse->be', a, encoder_output)                       # (B, He)
    x = jnp.concatenate([emb, c], axis=-1)                                # (B, E+He)
    gi = x @ m.w_ih.T + m.b_ih
    gh = s @ m.w_hh.T + m.b_hh
    r = jax.nn.sigmoid(gi[:, :Hd] + gh[:, :Hd])
    z = jax.nn.sigmoid(gi[:, Hd:2 * Hd] + gh[:, Hd:2 * Hd])
    n = jnp.tanh(gi[:, 2 * Hd:] + r * gh[:, 2 * Hd:])
    h_new = (1.0 - z) * n + z * s
    pred = jnp.concatenate([h_new, c, emb], axis=-1) @ m.w_out.T + m.b_out
    return pred, h_new


def _reference_decode(m, token_ids, s, encoder_output):
    preds = []
    for t in range(token_ids.shape[0]):
        p, s = _reference_step(m, token_ids[t], s, encoder_output)
        preds.append(p)
    return jnp.stack(preds, axis=0), s


if __name__ == "__main__":
    B, SRC_LEN, T = 16, 8, 4          # B multiple of 8 -> full sublanes, 2 batch blocks
    EMB, ENC_HID, DEC_HID, VOCAB = 16, 32, 32, 128   # V=128 -> lane-dense pred store

    key = jax.random.PRNGKey(0)
    k_param, k_tok, k_s, k_enc = jax.random.split(key, 4)

    decoder = AttentionDecoderPallas(VOCAB, EMB, ENC_HID, DEC_HID, k_param)

    token_ids = jax.random.randint(k_tok, (T, B), 0, VOCAB, dtype=jnp.int32)
    s0 = jax.random.normal(k_s, (B, DEC_HID), jnp.float32)
    encoder_output = jax.random.normal(k_enc, (B, SRC_LEN, ENC_HID), jnp.float32)

    # Tolerance 5e-3: the kernel softmax uses the EUP approximate reciprocal.
    TOL = dict(atol=5e-3, rtol=5e-3)

    # ---- single step: identical semantics to the PyTorch module forward -----
    pred, decoder_hidden = decoder(token_ids[0], s0, encoder_output)
    jax.block_until_ready((pred, decoder_hidden))
    pred_ref, hidden_ref = _reference_step(decoder, token_ids[0], s0, encoder_output)
    assert pred.shape == (B, VOCAB)
    assert decoder_hidden.shape == (B, DEC_HID)
    assert jnp.allclose(pred, pred_ref, **TOL), float(jnp.max(jnp.abs(pred - pred_ref)))
    assert jnp.allclose(decoder_hidden, hidden_ref, **TOL), \
        float(jnp.max(jnp.abs(decoder_hidden - hidden_ref)))

    # ---- fused multi-step decode: one pallas_call for the whole sequence ----
    pred_seq, h_final = decoder.decode(token_ids, s0, encoder_output)
    jax.block_until_ready((pred_seq, h_final))
    pred_seq_ref, h_final_ref = _reference_decode(decoder, token_ids, s0, encoder_output)
    assert pred_seq.shape == (T, B, VOCAB)
    assert jnp.allclose(pred_seq, pred_seq_ref, **TOL), \
        float(jnp.max(jnp.abs(pred_seq - pred_seq_ref)))
    assert jnp.allclose(h_final, h_final_ref, **TOL), \
        float(jnp.max(jnp.abs(h_final - h_final_ref)))

    print("KERNEL_OK")
</pallas_src>

<mosaic_0001>
module attributes {stable_mosaic.version = 11 : i64} {
  func.func @_attn_decoder_step_kernel(%arg0: i32, %arg1: i32, %arg2: memref<1x8x16xf32, #tpu.memory_space<vmem>>, %arg3: memref<8x32xf32, #tpu.memory_space<vmem>>, %arg4: memref<8x8x32xf32, #tpu.memory_space<vmem>>, %arg5: memref<64x32xf32, #tpu.memory_space<vmem>>, %arg6: memref<1x32xf32, #tpu.memory_space<vmem>>, %arg7: memref<80x96xf32, #tpu.memory_space<vmem>>, %arg8: memref<2x96xf32, #tpu.memory_space<vmem>>, %arg9: memref<80x128xf32, #tpu.memory_space<vmem>>, %arg10: memref<1x128xf32, #tpu.memory_space<vmem>>, %arg11: memref<1x8x128xf32, #tpu.memory_space<vmem>>, %arg12: memref<8x32xf32, #tpu.memory_space<vmem>>) attributes {dimension_semantics = [#tpu.dimension_semantics<parallel>, #tpu.dimension_semantics<arbitrary>], iteration_bounds = array<i64: 2, 1>, scalar_prefetch = 0 : i64, scratch_operands = 0 : i64, tpu.core_type = #tpu.core_type<tc>, window_params = [{transform_indices = @transform_0, window_bounds = array<i64: 1, 8, 16>}, {transform_indices = @transform_1, window_bounds = array<i64: 8, 32>}, {transform_indices = @transform_2, window_bounds = array<i64: 8, 8, 32>}, {pipeline_mode = #tpu.pipeline_mode<synchronous>, transform_indices = @transform_3, window_bounds = array<i64: 64, 32>}, {pipeline_mode = #tpu.pipeline_mode<synchronous>, transform_indices = @transform_4, window_bounds = array<i64: 1, 32>}, {pipeline_mode = #tpu.pipeline_mode<synchronous>, transform_indices = @transform_5, window_bounds = array<i64: 80, 96>}, {pipeline_mode = #tpu.pipeline_mode<synchronous>, transform_indices = @transform_6, window_bounds = array<i64: 2, 96>}, {pipeline_mode = #tpu.pipeline_mode<synchronous>, transform_indices = @transform_7, window_bounds = array<i64: 80, 128>}, {pipeline_mode = #tpu.pipeline_mode<synchronous>, transform_indices = @transform_8, window_bounds = array<i64: 1, 128>}, {transform_indices = @transform_9, window_bounds = array<i64: 1, 8, 128>}, {transform_indices = @transform_10, window_bounds = array<i64: 8, 32>}]} {
    %c0_i32 = arith.constant 0 : i32
    %0 = arith.cmpi eq, %arg1, %c0_i32 : i32
    %1 = arith.extui %0 : i1 to i32
    %c0_i32_0 = arith.constant 0 : i32
    %2 = arith.cmpi ne, %1, %c0_i32_0 : i32
    scf.if %2 {
      %c0_46 = arith.constant 0 : index
      %c0_47 = arith.constant 0 : index
      %90 = vector.load %arg3[%c0_46, %c0_47] : memref<8x32xf32, #tpu.memory_space<vmem>>, vector<8x32xf32>
      %c0_48 = arith.constant 0 : index
      %c0_49 = arith.constant 0 : index
      %91 = vector.load %arg12[%c0_48, %c0_49] : memref<8x32xf32, #tpu.memory_space<vmem>>, vector<8x32xf32>
      tpu.vector_store %arg12[%c0_48, %c0_49], %90 {strides = array<i32>} : memref<8x32xf32, #tpu.memory_space<vmem>>, vector<8x32xf32>,
    } else {
    }
    %c0 = arith.constant 0 : index
    %c0_1 = arith.constant 0 : index
    %c0_2 = arith.constant 0 : index
    %3 = vector.load %arg2[%c0, %c0_1, %c0_2] : memref<1x8x16xf32, #tpu.memory_space<vmem>>, vector<1x8x16xf32>
    %4 = vector.shape_cast %3 : vector<1x8x16xf32> to vector<8x16xf32>
    %c0_3 = arith.constant 0 : index
    %c0_4 = arith.constant 0 : index
    %5 = vector.load %arg12[%c0_3, %c0_4] : memref<8x32xf32, #tpu.memory_space<vmem>>, vector<8x32xf32>
    %c0_5 = arith.constant 0 : index
    %c0_6 = arith.constant 0 : index
    %c0_7 = arith.constant 0 : index
    %6 = vector.load %arg4[%c0_5, %c0_6, %c0_7] : memref<8x8x32xf32, #tpu.memory_space<vmem>>, vector<8x8x32xf32>
    %c0_8 = arith.constant 0 : index
    %c0_9 = arith.constant 0 : index
    %7 = vector.load %arg5[%c0_8, %c0_9] : memref<64x32xf32, #tpu.memory_space<vmem>>, vector<32x32xf32>
    %cst = arith.constant dense<0.000000e+00> : vector<8x32xf32>
    %8 = tpu.matmul %5, %7, %cst {dimension_numbers = #tpu.dot_dimension_numbers<[1], [0], [0], [1], [0, 0, 1, 1], [], []>} : vector<8x32xf32>, vector<32x32xf32>, vector<8x32xf32> -> vector<8x32xf32>
    %9 = vector.shape_cast %6 : vector<8x8x32xf32> to vector<64x32xf32>
    %c32 = arith.constant 32 : index
    %c0_10 = arith.constant 0 : index
    %10 = vector.load %arg5[%c32, %c0_10] : memref<64x32xf32, #tpu.memory_space<vmem>>, vector<32x32xf32>
    %cst_11 = arith.constant dense<0.000000e+00> : vector<64x32xf32>
    %11 = tpu.matmul %9, %10, %cst_11 {dimension_numbers = #tpu.dot_dimension_numbers<[1], [0], [0], [1], [0, 0, 1, 1], [], []>} : vector<64x32xf32>, vector<32x32xf32>, vector<64x32xf32> -> vector<64x32xf32>
    %12 = vector.shape_cast %11 : vector<64x32xf32> to vector<8x8x32xf32>
    %13 = vector.shape_cast %8 : vector<8x32xf32> to vector<8x1x32xf32>
    %14 = vector.broadcast %13 : vector<8x1x32xf32> to vector<8x8x32xf32>
    %15 = arith.addf %12, %14 : vector<8x8x32xf32>
    %16 = math.tanh %15 : vector<8x8x32xf32>
    %c0_12 = arith.constant 0 : index
    %c0_13 = arith.constant 0 : index
    %17 = vector.load %arg6[%c0_12, %c0_13] : memref<1x32xf32, #tpu.memory_space<vmem>>, vector<1x32xf32>
    %18 = vector.shape_cast %17 : vector<1x32xf32> to vector<1x1x32xf32>
    %19 = vector.broadcast %18 : vector<1x1x32xf32> to vector<8x8x32xf32>
    %20 = arith.mulf %16, %19 : vector<8x8x32xf32>
    %cst_14 = arith.constant dense<0.000000e+00> : vector<8x8xf32>
    %21 = vector.multi_reduction <add>, %20, %cst_14 [2] : vector<8x8x32xf32> to vector<8x8xf32>
    %cst_15 = arith.constant dense<0xFF800000> : vector<8xf32>
    %22 = vector.multi_reduction <maximumf>, %21, %cst_15 [1] : vector<8x8xf32> to vector<8xf32>
    %23 = vector.shape_cast %22 : vector<8xf32> to vector<8x1xf32>
    %24 = vector.broadcast %23 : vector<8x1xf32> to vector<8x8xf32>
    %25 = arith.subf %21, %24 : vector<8x8xf32>
    %26 = math.exp %25 : vector<8x8xf32>
    %cst_16 = arith.constant dense<0.000000e+00> : vector<8xf32>
    %27 = vector.multi_reduction <add>, %26, %cst_16 [1] : vector<8x8xf32> to vector<8xf32>
    %28 = vector.shape_cast %27 : vector<8xf32> to vector<8x1xf32>
    %29 = tpu.reciprocal %28 {approx = true} : vector<8x1xf32> -> vector<8x1xf32>
    %30 = vector.broadcast %29 : vector<8x1xf32> to vector<8x8xf32>
    %31 = arith.mulf %26, %30 : vector<8x8xf32>
    %32 = vector.shape_cast %31 : vector<8x8xf32> to vector<8x8x1xf32>
    %33 = vector.broadcast %32 : vector<8x8x1xf32> to vector<8x8x32xf32>
    %34 = arith.mulf %33, %6 : vector<8x8x32xf32>
    %cst_17 = arith.constant dense<0.000000e+00> : vector<8x32xf32>
    %35 = vector.multi_reduction <add>, %34, %cst_17 [1] : vector<8x8x32xf32> to vector<8x32xf32>
    %c0_18 = arith.constant 0 : index
    %c0_19 = arith.constant 0 : index
    %36 = vector.load %arg7[%c0_18, %c0_19] : memref<80x96xf32, #tpu.memory_space<vmem>>, vector<16x96xf32>
    %cst_20 = arith.constant dense<0.000000e+00> : vector<8x96xf32>
    %37 = tpu.matmul %4, %36, %cst_20 {dimension_numbers = #tpu.dot_dimension_numbers<[1], [0], [0], [1], [0, 0, 1, 1], [], []>} : vector<8x16xf32>, vector<16x96xf32>, vector<8x96xf32> -> vector<8x96xf32>
    %c16 = arith.constant 16 : index
    %c0_21 = arith.constant 0 : index
    %38 = vector.load %arg7[%c16, %c0_21] : memref<80x96xf32, #tpu.memory_space<vmem>>, vector<32x96xf32>
    %cst_22 = arith.constant dense<0.000000e+00> : vector<8x96xf32>
    %39 = tpu.matmul %35, %38, %cst_22 {dimension_numbers = #tpu.dot_dimension_numbers<[1], [0], [0], [1], [0, 0, 1, 1], [], []>} : vector<8x32xf32>, vector<32x96xf32>, vector<8x96xf32> -> vector<8x96xf32>
    %40 = arith.addf %37, %39 : vector<8x96xf32>
    %c0_23 = arith.constant 0 : index
    %c0_24 = arith.constant 0 : index
    %41 = vector.load %arg8[%c0_23, %c0_24] : memref<2x96xf32, #tpu.memory_space<vmem>>, vector<1x96xf32>
    %42 = vector.broadcast %41 : vector<1x96xf32> to vector<8x96xf32>
    %43 = arith.addf %40, %42 : vector<8x96xf32>
    %c48 = arith.constant 48 : index
    %c0_25 = arith.constant 0 : index
    %44 = vector.load %arg7[%c48, %c0_25] : memref<80x96xf32, #tpu.memory_space<vmem>>, vector<32x96xf32>
    %cst_26 = arith.constant dense<0.000000e+00> : vector<8x96xf32>
    %45 = tpu.matmul %5, %44, %cst_26 {dimension_numbers = #tpu.dot_dimension_numbers<[1], [0], [0], [1], [0, 0, 1, 1], [], []>} : vector<8x32xf32>, vector<32x96xf32>, vector<8x96xf32> -> vector<8x96xf32>
    %c1 = arith.constant 1 : index
    %c0_27 = arith.constant 0 : index
    %46 = vector.load %arg8[%c1, %c0_27] : memref<2x96xf32, #tpu.memory_space<vmem>>, vector<1x96xf32>
    %47 = vector.broadcast %46 : vector<1x96xf32> to vector<8x96xf32>
    %48 = arith.addf %45, %47 : vector<8x96xf32>
    %49 = vector.extract_strided_slice %43 {offsets = [0, 0], sizes = [8, 32], strides = [1, 1]} : vector<8x96xf32> to vector<8x32xf32>
    %50 = vector.extract_strided_slice %48 {offsets = [0, 0], sizes = [8, 32], strides = [1, 1]} : vector<8x96xf32> to vector<8x32xf32>
    %51 = arith.addf %49, %50 : vector<8x32xf32>
    %52 = arith.negf %51 : vector<8x32xf32>
    %53 = math.exp %52 : vector<8x32xf32>
    %cst_28 = arith.constant 1.000000e+00 : f32
    %54 = vector.broadcast %cst_28 : f32 to vector<8x32xf32>
    %55 = arith.addf %54, %53 : vector<8x32xf32>
    %56 = arith.divf %54, %55 : vector<8x32xf32>
    %57 = vector.extract_strided_slice %43 {offsets = [0, 32], sizes = [8, 32], strides = [1, 1]} : vector<8x96xf32> to vector<8x32xf32>
    %58 = vector.extract_strided_slice %48 {offsets = [0, 32], sizes = [8, 32], strides = [1, 1]} : vector<8x96xf32> to vector<8x32xf32>
    %59 = arith.addf %57, %58 : vector<8x32xf32>
    %60 = arith.negf %59 : vector<8x32xf32>
    %61 = math.exp %60 : vector<8x32xf32>
    %cst_29 = arith.constant 1.000000e+00 : f32
    %62 = vector.broadcast %cst_29 : f32 to vector<8x32xf32>
    %63 = arith.addf %62, %61 : vector<8x32xf32>
    %64 = arith.divf %62, %63 : vector<8x32xf32>
    %65 = vector.extract_strided_slice %43 {offsets = [0, 64], sizes = [8, 32], strides = [1, 1]} : vector<8x96xf32> to vector<8x32xf32>
    %66 = vector.extract_strided_slice %48 {offsets = [0, 64], sizes = [8, 32], strides = [1, 1]} : vector<8x96xf32> to vector<8x32xf32>
    %67 = arith.mulf %56, %66 : vector<8x32xf32>
    %68 = arith.addf %65, %67 : vector<8x32xf32>
    %69 = math.tanh %68 : vector<8x32xf32>
    %cst_30 = arith.constant 1.000000e+00 : f32
    %70 = vector.broadcast %cst_30 : f32 to vector<8x32xf32>
    %71 = arith.subf %70, %64 : vector<8x32xf32>
    %72 = arith.mulf %71, %69 : vector<8x32xf32>
    %73 = arith.mulf %64, %5 : vector<8x32xf32>
    %74 = arith.addf %72, %73 : vector<8x32xf32>
    %c0_31 = arith.constant 0 : index
    %c0_32 = arith.constant 0 : index
    %75 = vector.load %arg9[%c0_31, %c0_32] : memref<80x128xf32, #tpu.memory_space<vmem>>, vector<32x128xf32>
    %cst_33 = arith.constant dense<0.000000e+00> : vector<8x128xf32>
    %76 = tpu.matmul %74, %75, %cst_33 {dimension_numbers = #tpu.dot_dimension_numbers<[1], [0], [0], [1], [0, 0, 1, 1], [], []>} : vector<8x32xf32>, vector<32x128xf32>, vector<8x128xf32> -> vector<8x128xf32>
    %c32_34 = arith.constant 32 : index
    %c0_35 = arith.constant 0 : index
    %77 = vector.load %arg9[%c32_34, %c0_35] : memref<80x128xf32, #tpu.memory_space<vmem>>, vector<32x128xf32>
    %cst_36 = arith.constant dense<0.000000e+00> : vector<8x128xf32>
    %78 = tpu.matmul %35, %77, %cst_36 {dimension_numbers = #tpu.dot_dimension_numbers<[1], [0], [0], [1], [0, 0, 1, 1], [], []>} : vector<8x32xf32>, vector<32x128xf32>, vector<8x128xf32> -> vector<8x128xf32>
    %79 = arith.addf %76, %78 : vector<8x128xf32>
    %c64 = arith.constant 64 : index
    %c0_37 = arith.constant 0 : index
    %80 = vector.load %arg9[%c64, %c0_37] : memref<80x128xf32, #tpu.memory_space<vmem>>, vector<16x128xf32>
    %cst_38 = arith.constant dense<0.000000e+00> : vector<8x128xf32>
    %81 = tpu.matmul %4, %80, %cst_38 {dimension_numbers = #tpu.dot_dimension_numbers<[1], [0], [0], [1], [0, 0, 1, 1], [], []>} : vector<8x16xf32>, vector<16x128xf32>, vector<8x128xf32> -> vector<8x128xf32>
    %82 = arith.addf %79, %81 : vector<8x128xf32>
    %c0_39 = arith.constant 0 : index
    %c0_40 = arith.constant 0 : index
    %83 = vector.load %arg10[%c0_39, %c0_40] : memref<1x128xf32, #tpu.memory_space<vmem>>, vector<1x128xf32>
    %84 = vector.broadcast %83 : vector<1x128xf32> to vector<8x128xf32>
    %85 = arith.addf %82, %84 : vector<8x128xf32>
    %c0_41 = arith.constant 0 : index
    %c0_42 = arith.constant 0 : index
    %c0_43 = arith.constant 0 : index
    %86 = vector.load %arg11[%c0_41, %c0_42, %c0_43] : memref<1x8x128xf32, #tpu.memory_space<vmem>>, vector<1x8x128xf32>
    %87 = vector.shape_cast %86 : vector<1x8x128xf32> to vector<8x128xf32>
    %88 = vector.shape_cast %85 : vector<8x128xf32> to vector<1x8x128xf32>
    tpu.vector_store %arg11[%c0_41, %c0_42, %c0_43], %88 {strides = array<i32>} : memref<1x8x128xf32, #tpu.memory_space<vmem>>, vector<1x8x128xf32>,
    %c0_44 = arith.constant 0 : index
    %c0_45 = arith.constant 0 : index
    %89 = vector.load %arg12[%c0_44, %c0_45] : memref<8x32xf32, #tpu.memory_space<vmem>>, vector<8x32xf32>
    tpu.vector_store %arg12[%c0_44, %c0_45], %74 {strides = array<i32>} : memref<8x32xf32, #tpu.memory_space<vmem>>, vector<8x32xf32>,
    return
  }
  func.func @transform_0(%arg0: i32, %arg1: i32) -> (i32, i32, i32) {
    %c0_i32 = arith.constant 0 : i32
    %c0_i32_0 = arith.constant 0 : i32
    return %arg1, %arg0, %c0_i32 : i32, i32, i32
  }
  func.func @transform_1(%arg0: i32, %arg1: i32) -> (i32, i32) {
    %c0_i32 = arith.constant 0 : i32
    %c0_i32_0 = arith.constant 0 : i32
    return %arg0, %c0_i32 : i32, i32
  }
  func.func @transform_2(%arg0: i32, %arg1: i32) -> (i32, i32, i32) {
    %c0_i32 = arith.constant 0 : i32
    %c0_i32_0 = arith.constant 0 : i32
    %c0_i32_1 = arith.constant 0 : i32
    return %arg0, %c0_i32, %c0_i32_0 : i32, i32, i32
  }
  func.func @transform_3(%arg0: i32, %arg1: i32) -> (i32, i32) {
    %c0_i32 = arith.constant 0 : i32
    %c0_i32_0 = arith.constant 0 : i32
    %c0_i32_1 = arith.constant 0 : i32
    return %c0_i32, %c0_i32_0 : i32, i32
  }
  func.func @transform_4(%arg0: i32, %arg1: i32) -> (i32, i32) {
    %c0_i32 = arith.constant 0 : i32
    %c0_i32_0 = arith.constant 0 : i32
    %c0_i32_1 = arith.constant 0 : i32
    return %c0_i32, %c0_i32_0 : i32, i32
  }
  func.func @transform_5(%arg0: i32, %arg1: i32) -> (i32, i32) {
    %c0_i32 = arith.constant 0 : i32
    %c0_i32_0 = arith.constant 0 : i32
    %c0_i32_1 = arith.constant 0 : i32
    return %c0_i32, %c0_i32_0 : i32, i32
  }
  func.func @transform_6(%arg0: i32, %arg1: i32) -> (i32, i32) {
    %c0_i32 = arith.constant 0 : i32
    %c0_i32_0 = arith.constant 0 : i32
    %c0_i32_1 = arith.constant 0 : i32
    return %c0_i32, %c0_i32_0 : i32, i32
  }
  func.func @transform_7(%arg0: i32, %arg1: i32) -> (i32, i32) {
    %c0_i32 = arith.constant 0 : i32
    %c0_i32_0 = arith.constant 0 : i32
    %c0_i32_1 = arith.constant 0 : i32
    return %c0_i32, %c0_i32_0 : i32, i32
  }
  func.func @transform_8(%arg0: i32, %arg1: i32) -> (i32, i32) {
    %c0_i32 = arith.constant 0 : i32
    %c0_i32_0 = arith.constant 0 : i32
    %c0_i32_1 = arith.constant 0 : i32
    return %c0_i32, %c0_i32_0 : i32, i32
  }
  func.func @transform_9(%arg0: i32, %arg1: i32) -> (i32, i32, i32) {
    %c0_i32 = arith.constant 0 : i32
    %c0_i32_0 = arith.constant 0 : i32
    return %arg1, %arg0, %c0_i32 : i32, i32, i32
  }
  func.func @transform_10(%arg0: i32, %arg1: i32) -> (i32, i32) {
    %c0_i32 = arith.constant 0 : i32
    %c0_i32_0 = arith.constant 0 : i32
    return %arg0, %c0_i32 : i32, i32
  }
}

</mosaic_0001>

<bundles_post_ra>
// kernel: tpu_custom_call.1
= control target key start
LH: loop header
LB: loop body
LE: loop exit
PB: predicated region body
PF: predicated region fallthrough
CT: control target
= control target key end

     0   :  { %s3164_s0 = inlined_call_operand.vmem [shape: f32[1,16,16], index: 0, kind: input, shape index: {}]   ;;  %s3165_s1 = inlined_call_operand.vmem [shape: f32[16,32], index: 1, kind: input, shape index: {}]   ;;  %s3166_s2 = inlined_call_operand.hbm [shape: f32[16,8,32], index: 2, kind: input, shape index: {}]   ;;  %s3167_s3 = inlined_call_operand.vmem [shape: f32[64,32], index: 3, kind: input, shape index: {}]   ;;  %s3168_s4 = inlined_call_operand.hbm [shape: f32[1,32], index: 4, kind: input, shape index: {}]   ;;  %s3169_s5 = inlined_call_operand.vmem [shape: f32[80,96], index: 5, kind: input, shape index: {}]   ;;  %s3170_s6 = inlined_call_operand.vmem [shape: f32[2,96], index: 6, kind: input, shape index: {}]   ;;  %s3171_s7 = inlined_call_operand.hbm [shape: f32[80,128], index: 7, kind: input, shape index: {}]   ;;  %s3172_s8 = inlined_call_operand.vmem [shape: f32[1,128], index: 8, kind: input, shape index: {}]   ;;  %s3173_s9 = inlined_call_operand.hbm [shape: f32[1,16,128], index: 9, kind: output, shape index: {0}]   ;;  %s3174_s10 = inlined_call_operand.hbm [shape: f32[16,32], index: 10, kind: output, shape index: {1}]  }
   0x1   :  { %3187 = sst [smem:[#allocation18_spill]] %s3168_s4 }
   0x2   :  { %3188 = sst [smem:[#allocation19_spill]] %s3172_s8 }
   0x3   :  { %3189 = sst [smem:[#allocation20_spill]] %s3173_s9 }
   0x4   :  { %16 = vsyncpa [#allocation3], 0 }
   0x5   :  { %18 = vsyncpa [#allocation3 + $0x1], 0 }
   0x6   :  { %19 = vsyncpa [#allocation6], 0 }
   0x7   :  { %20 = vsyncpa [#allocation4], 0 }
   0x8   :  { %22 = vsyncpa [#allocation4 + $0x1], 0 }
   0x9   :  { %23 = vsyncpa [#allocation10], 0 }
   0xa   :  { %25 = vsyncpa [#allocation10 + $0x1], 0  ;;  %s2556_s13 = smov 0   ;;  %s2558_s14 = smov 0  }
   0xb   :  { %s2560_s15 = smov 0   ;;  %s2562_s16 = smov 0  }
   0xc   :  { %s2564_s17 = smov 0   ;;  %s2566_s18 = smov 0  }
   0xd LB: > { %3190 = sst [smem:[#allocation15_spill]] %s2464_s13  ;;  %s1920_s19 = sadd.s32 4294967295, %s2484_s18   ;;  %s2484_s18 = sphi %s2566_s18, %s31_s18   ;;  %s2480_s17 = sphi %s2564_s17, %s3222_s17   ;;  %s2476_s16 = sphi %s2562_s16, %s3221_s16   ;;  %s2472_s15 = sphi %s2560_s15, %s3220_s15   ;;  %s2468_s14 = sphi %s2558_s14, %s3219_s14   ;;  %s2464_s13 = sphi %s2556_s13, %s3218_s13  }
   0xe   : > { %3191 = sst [smem:[#allocation16_spill]] %s2484_s18  ;;  %s1921_s20 = sadd.s32 4294967294, %s2484_s18  }
   0xf   : > { %p111_p0 = scmp.ne.s32.totalorder %s2472_s15, %s2468_s14  ;;  %p112_p1 = scmp.eq.s32.totalorder %s2484_s18, 0 }
  0x10   : > { %p117_p2 = scmp.ne.s32.totalorder %s2468_s14, %s2464_s13  ;;  %p2593_p3 = scmp.eq.s32.totalorder %s1920_s19, 0 }
  0x11   : > { %p269_p4 = scmp.eq.s32.totalorder %s1920_s19, 1  ;;  %p2597_p5 = por %p112_p1, %p111_p0 }
  0x12   : > { %s3192_s21 = scalar_select %p2593_p3, 1, 0 }
  0x13   : > { %p275_p6 = scmp.eq.s32.totalorder %s1921_s20, 1  ;;  %p2603_p7 = por %p2593_p3, %p117_p2 }
  0x14   : > { %p2607_p8 = por %p269_p4, %p111_p0  ;;  %p1922_p10 = scmp.ge.s32.totalorder %s2484_s18, 1 }
  0x15   : > { %s3194_s23 = scalar_select %p2603_p7, 1, 0 }
  0x16   : > { %s3195_s24 = scalar_select %p2607_p8, 1, 0 }
  0x17   : > { %p2611_p9 = por %p275_p6, %p117_p2  ;;  %p308_p11 = scmp.lt.s32.totalorder %s2484_s18, 3 }
  0x18   : > { %s2486_s27 = smov [#allocation5]   ;;  %p2174_p1 = scmp.lt.s32.totalorder %s2484_s18, 2 }
  0x19   : > { %s3196_s25 = scalar_select %p2611_p9, 1, 0 }
  0x1a   : > { %p2618_p13 = pnand %p1922_p10, %p308_p11  ;;  %s324_s28 = sshll.u32 %s2486_s27, 4  ;;  %s325_s28 = int_to_ptr.vmem [resolvable:$true] %s324_s28 }
  0x1b   : > { %3197 = sst [smem:[#allocation17_spill]] %s3196_s25  ;;  %p2627_p4 = pnand %p2174_p1, %p2597_p5 }
  0x1c   : > { %s3198_s26 = scalar_select %p2618_p13, 1, 0 }
  0x1d   : > { %p2154_p0 = pneg %p2618_p13  ;;  %s2487_s30 = smov [#allocation7]  }
  0x1e   : > { %s3199_s29 = scalar_select %p2627_p4, 1, 0 }
  0x1f   : > { %s340_s11 = sshll.u32 %s2487_s30, 4  ;;  %p2633_p2 = pnand %p2154_p0, %p2593_p3  ;;  %s2637_s11 = int_to_ptr.vmem [resolvable:$true] %s340_s11 }
  0x20   : > { %s3201_s4 = sld [smem:[#allocation18_spill]] }
  0x21   : > { %p2282_p6 = pneg %p2633_p2 }
  0x26   : > { %s2280_s27 = scalar_lea.hbm %s3201_s4, 16 }
  0x27   : > { %p2281_p5 = scmp.ne.s32.totalorder %s3201_s4, %s2280_s27  ;;  %p2287_p1 = scmp.lt.u32.totalorder %s2280_s27, %s3201_s4 }
  0x29   : > { %p2283_p10 = pnand %p2282_p6, %p2281_p5 }
  0x2b   : > { %p2284_p11 = pneg %p2283_p10 }
  0x2d   : > { %p2289_p0 = pnand %p2287_p1, %p2284_p11 }
  0x2f   : > { %2292 = shalt.err (!%p2289_p0)
}
  0x30   : > { %s2293_s13 = scalar_lea.vmem %s325_s28, 16  ;;  %s2300_s18 = scalar_lea.vmem %s325_s28, 32 }
  0x31   : > { %p2294_p12 = scmp.ne.s32.totalorder %s325_s28, %s2293_s13  ;;  %p2301_p3 = scmp.lt.s32.totalorder %s325_s28, %s325_s28 }
  0x32   : > { %p2302_p7 = scmp.lt.s32.totalorder %s2300_s18, %s2293_s13 }
  0x33   : > { %p2296_p9 = pnand %p2294_p12, %p2282_p6 }
  0x34   : > { %p2303_p13 = por %p2302_p7, %p2301_p3 }
  0x35   : > { %p2297_p8 = pneg %p2296_p9 }
  0x37   : > { %p2304_p4 = pnand %p2303_p13, %p2297_p8 }
  0x39   : > { %2307 = shalt.err (!%p2304_p4)
}
  0x3a   : > { %2157 = dma.hbm_to_vmem [thread:$0]  (!%p2633_p2), %s3201_s4, 16, %s325_s28, [#allocation6]  }
  0x3b   : > { %s2308_s22 = scalar_lea.hbm %s3171_s7, 1280 }
  0x3c   : > { %p2309_p9 = scmp.ne.s32.totalorder %s3171_s7, %s2308_s22  ;;  %p2315_p8 = scmp.lt.u32.totalorder %s2308_s22, %s3171_s7 }
  0x3e   : > { %p2311_p3 = pnand %p2309_p9, %p2282_p6 }
  0x40   : > { %p2312_p7 = pneg %p2311_p3 }
  0x42   : > { %p2317_p12 = pnand %p2315_p8, %p2312_p7 }
  0x44   : > { %2320 = shalt.err (!%p2317_p12)
}
  0x45   : > { %s2321_s28 = scalar_lea.vmem %s2637_s11, 1280  ;;  %p2329_p10 = scmp.lt.s32.totalorder %s2637_s11, %s2637_s11 }
  0x46   : > { %p2322_p13 = scmp.ne.s32.totalorder %s2637_s11, %s2321_s28  ;;  %p2330_p11 = scmp.lt.s32.totalorder %s2321_s28, %s2321_s28 }
  0x48   : > { %p2324_p4 = pnand %p2322_p13, %p2282_p6  ;;  %p2331_p1 = por %p2330_p11, %p2329_p10 }
  0x4a   : > { %p2325_p5 = pneg %p2324_p4 }
  0x4c   : > { %p2332_p0 = pnand %p2331_p1, %p2325_p5 }
  0x4e   : > { %2335 = shalt.err (!%p2332_p0)
}
  0x4f   : > { %s3186_s9 = smov 128   ;;  %s2489_s19 = smov 8  }
  0x50   : > { %2160 = dma.hbm_to_vmem [thread:$0]  (!%p2633_p2), %s3171_s7, 1280, %s2637_s11, [#allocation6], %s3186_s9, %s3186_s9, %s2489_s19  }
  0x51   : > { %s375_s27 = sand.u32 1, %s2472_s15   ;;  %s43_s22 = sadd.s32 1, %s2480_s17 }
  0x52   : > { %s1926_s30 = sshll.u32 %s375_s27, 6  ;;  %p45_p6 = scmp.ge.s32.totalorder %s43_s22, 2 }
  0x53   : > { %s1963_s13 = sshll.u32 %s2480_s17, 10  ;;  %s379_s18 = scalar_lea.vmem [#allocation2], %s1926_s30 }
  0x54   : > { %s386_s28 = sshll.u32 %s379_s18, 4  ;;  %s3224_s22 = smov (%p45_p6, %s43_s22), 0  ;;  %s2699_s28 = int_to_ptr.vmem [resolvable:$true] %s386_s28 }
  0x55   : > { %s2697_s8 = scalar_lea.hbm %s3166_s2, %s1963_s13  ;;  %s101_s25 = ssub.s32 %s2480_s17, %s3224_s22 }
  0x56   : > { %p2704_p2 = scmp.eq.s32.totalorder %s101_s25, 0  ;;  %s2708_s30 = scalar_lea.sflag [#allocation3], %s375_s27 }
  0x57   : > { %s2336_s18 = scalar_lea.hbm %s2697_s8, 1024  ;;  %p3203_p3 = scmp.ne.s32.totalorder %s3199_s29, 0 }
  0x58   : > { %p2337_p9 = scmp.ne.s32.totalorder %s2697_s8, %s2336_s18  ;;  %s2341_s12 = scalar_lea.hbm %s3166_s2, 2048 }
  0x59   : > { %p2338_p7 = pneg %p3203_p3  ;;  %p2342_p13 = scmp.lt.u32.totalorder %s2697_s8, %s3166_s2 }
  0x5a   : > { %p2343_p4 = scmp.lt.u32.totalorder %s2341_s12, %s2336_s18  ;;  %p2345_p10 = scmp.lt.u32.totalorder %s2336_s18, %s2697_s8 }
  0x5b   : > { %p2339_p8 = pnand %p2338_p7, %p2337_p9 }
  0x5c   : > { %p2344_p5 = por %p2343_p4, %p2342_p13 }
  0x5d   : > { %p2340_p12 = pneg %p2339_p8 }
  0x5e   : > { %p2346_p11 = por %p2345_p10, %p2344_p5 }
  0x60   : > { %p2347_p1 = pnand %p2346_p11, %p2340_p12 }
  0x62   : > { %2350 = shalt.err (!%p2347_p1)
}
  0x63   : > { %s2351_s27 = scalar_lea.vmem %s2699_s28, 1024  ;;  %s2490_s25 = smov [#allocation2]  }
  0x64   : > { %p2352_p0 = scmp.ne.s32.totalorder %s2699_s28, %s2351_s27  ;;  %s2356_s4 = sshll.u32 %s2490_s25, 4  ;;  %s2357_s4 = int_to_ptr.vmem [resolvable:$false] %s2356_s4 }
  0x65   : > { %s2358_s9 = scalar_lea.vmem %s2357_s4, 2048  ;;  %p2359_p8 = scmp.lt.s32.totalorder %s2699_s28, %s2357_s4 }
  0x66   : > { %p2354_p6 = pnand %p2352_p0, %p2338_p7  ;;  %p2360_p13 = scmp.lt.s32.totalorder %s2358_s9, %s2351_s27 }
  0x68   : > { %p2355_p9 = pneg %p2354_p6  ;;  %p2361_p4 = por %p2360_p13, %p2359_p8 }
  0x6a   : > { %p2362_p5 = pnand %p2361_p4, %p2355_p9 }
  0x6c   : > { %2365 = shalt.err (!%p2362_p5)
}
  0x6d   : > { %s3204_s11 = smov 128   ;;  %s3205_s18 = sadd.s32 1, %s2472_s15 }
  0x6e   : > { %2164 = dma.hbm_to_vmem [thread:$0]  (!%p3203_p3), %s2697_s8, 1024, %s2699_s28, %s2708_s30, %s3204_s11, %s3204_s11, %s2489_s19  }
  0x6f   : > { %s2744_s13 = scalar_select %p2704_p2, %s2472_s15, %s3205_s18  }
  0x70   : > { %p3206_p7 = scmp.ne.s32.totalorder %s3198_s26, 0 }
  0x71   : > { %s2749_s29 = sand.u32 (!%p3206_p7), 1, %s2468_s14   ;;  %p3207_p12 = scmp.ne.s32.totalorder (!%p3206_p7), %s3194_s23, 0 }
  0x72   : > { %398 = sbr.rel (%p3206_p7) target bundleno = 2027 (0x7eb), region = 56  ;;  %s1930_s12 = sshll.u32 (!%p3206_p7), %s2749_s29, 6 }
  0x73   : > { %s401_s27 = scalar_lea.sflag (!%p3206_p7), [#allocation3], %s2749_s29  ;;  %s2753_s25 = scalar_lea.vmem (!%p3206_p7), [#allocation2], %s1930_s12 }
  0x79   : > { %2447 = dma.done.wait (%p3207_p12), %s401_s27, 1024  }
  0x7a   : > { %2449 = vsyncadd (%p3207_p12), %s401_s27, 4294966272  ;;  %p3208_p2 = scmp.ne.s32.totalorder %s3192_s21, 0 }
  0x7c   : > { %2451 = dma.done.wait (%p3208_p2), [#allocation6], 1296  }
  0x7d   : > { %2453 = vsyncadd (%p3208_p2), [#allocation6], 4294966000  ;;  %v2491_v0 = vmov 0.0|0.0   ;;  %vm2492_vm0 = vmmov 0   ;;  %v2493_v1 = vmov 0.0   ;;  %p468_p3 = scmp.lt.s32.totalorder %s2476_s16, 1  ;;  %v712_v26 = vlaneseq }
  0x7e   : > { %2096 = vmatprep.subr.bf16.mxu0 %v2491_v0  ;;  %2015 = vmatprep.mubr.msk.f32.mxu0 %vm2492_vm0, %v2493_v1  ;;  %s1933_s23 = sshll.u32 %s2749_s29, 3  ;;  %v496_v2 = vld [vmem:[%s3167_s3] sm:$0xff]  ;;  %v497_v3 = vld [vmem:[%s3167_s3 + $0x8] sm:$0xff]  ;;  %vm484_vm1 = vcmask 261120   ;;  %v498_v7 = vld [vmem:[%s3167_s3 + $0x10] sm:$0xff]  ;;  %vm894_vm2 = vcmask 1041409  }
  0x7f   : > { %s2768_s8 = scalar_select %p468_p3, %s2476_s16, 1  ;;  %v574_v4 = vld [vmem:[%s3167_s3 + $0x20] sm:$0xff]  ;;  %v2097_v5 = vpack.c.bf16 %v497_v3, %v496_v2  ;;  %v575_v6 = vld [vmem:[%s3167_s3 + $0x28] sm:$0xff]  ;;  %v499_v8 = vld [vmem:[%s3167_s3 + $0x18] sm:$0xff]  ;;  %v2494_v24 = vmov 1966171168  }
  0x80   : > { %v2102_v9 = vpack.c.bf16 %v575_v6, %v574_v4  ;;  %v576_v10 = vld [vmem:[%s3167_s3 + $0x30] sm:$0xff]  ;;  %v577_v11 = vld [vmem:[%s3167_s3 + $0x38] sm:$0xff]  ;;  %v2100_v13 = vpack.c.bf16 %v499_v8, %v498_v7  ;;  %s2803_s12 = scalar_lea.vmem [#allocation9], %s1933_s23  ;;  %v2808_v15 = vld [vmem:[%s2753_s25] sm:$0xff]  ;;  %v710_v25 = vunpack.c.l.s4 %v2494_v24  ;;  %v2860_v28 = vshrl.u32 %v712_v26, 7  ;;  %s2496_s4 = smov 64  }
  0x81   : > { %s1935_s26 = sshll.u32 %s2768_s8, 3  ;;  %2098 = vmatpush3.bf16.msra.mxu0 %v2097_v5  ;;  %v2106_v14 = vpack.c.bf16 %v577_v11, %v576_v10  ;;  %2026 = vmatprep.mubr.msk.f32.mxu1 %vm484_vm1, %v2808_v15  ;;  %v2815_v16 = vld [vmem:[%s2753_s25 + $0x8] sm:$0xff]  ;;  %v2821_v18 = vld [vmem:[%s2753_s25 + $0x10] sm:$0xff]  ;;  %v2833_v19 = vld [vmem:[%s2753_s25 + $0x18] sm:$0xff]  ;;  %vm896_vm3 = vcmask 1042434   ;;  %vm898_vm4 = vcmask 1043459  }
  0x82   : > { %s477_s28 = scalar_lea.vmem %s3165_s1, %s1935_s26  ;;  %2103 = vmatprep.subr.bf16.mxu1 %v2102_v9  ;;  %2099 = vmatprep.subr.bf16.mxu0 %v2491_v0  ;;  %v2836_v20 = vld [vmem:[%s2753_s25 + $0x20] sm:$0xff]  ;;  %v2843_v21 = vld [vmem:[%s2753_s25 + $0x28] sm:$0xff]  ;;  %v2846_v22 = vld [vmem:[%s2753_s25 + $0x30] sm:$0xff]  ;;  %v711_v27 = vunpack.c.0.s8 %v710_v25  ;;  %v2864_v35 = vsub.s32 0, %v2860_v28  ;;  %vm900_vm5 = vcmask 1044484   ;;  %vm902_vm6 = vcmask 1045509   ;;  %s473_s21 = scalar_lea.vmem %s3164_s0, %s1935_s26 }
  0x83   : > { %v483_v12 = vld [vmem:[%s477_s28] sm:$0xff]  ;;  %2105 = vmatpush3.bf16.msra.mxu1 %v2102_v9  ;;  %v2853_v23 = vld [vmem:[%s2753_s25 + $0x38] sm:$0xff]  ;;  %vm904_vm7 = vcmask 1046534   ;;  %vm906_vm8 = vcmask 1047559   ;;  %vm909_vm9 = vcmask 64512   ;;  %vm1300_vm10 = vcmask 130048  }
  0x84   : > { %485 = vst.msk [vmem:[%s2803_s12] sm:$0xff] %vm484_vm1, %v483_v12  ;;  %2107 = vmatprep.subr.bf16.mxu1 %v2106_v14  ;;  %v714_v29 = vsub.s32 %v711_v27, %v2860_v28  ;;  %v1946_v8 = vld [vmem:[#allocation5] ss:$0 sm:$0xff]  ;;  %s2497_s19 = smov 96   ;;  %s2498_s20 = smov 32  }
  0x85   : > { %2101 = vmatpush3.bf16.msra.mxu0 %v2100_v13  ;;  %s1959_s30 = sshll.u32 %s2476_s16, 7  ;;  %s1759_s18 = sshll.u32 %s2803_s12, 4  ;;  %s1760_s18 = int_to_ptr.vmem [resolvable:$true] %s1759_s18 }
  0x86   : > { %2110 = vmatprep.subr.bf16.mxu0 %v2491_v0  ;;  %s3083_s11 = scalar_lea.hbm %s3174_s10, %s1959_s30  ;;  %s1731_s25 = scalar_lea.sflag [#allocation10], %s2749_s29 }
  0x87   : > { %2109 = vmatpush3.bf16.msra.mxu1 %v2106_v14  ;;  %s2366_s28 = scalar_lea.vmem %s1760_s18, 128  ;;  %p3209_p11 = scmp.ne.s32.totalorder %s3195_s24, 0 }
  0x88   : > { %2119 = vmatprep.subr.bf16.mxu1 %v2491_v0  ;;  %p2367_p10 = scmp.ne.s32.totalorder %s1760_s18, %s2366_s28  ;;  %s2499_s27 = smov [#allocation9]  }
  0x8a   : > { %2027 = vmatmul.mubr.msk.f32.vlgmr.msra.gmra.mrb[0].mxu1 %vm484_vm1, %v2815_v16  ;;  %p2368_p1 = pnand %p2367_p10, %p3209_p11 }
  0x8b   : > { %v2818_v17 = vld [vmem:[%s2803_s12] sm:$0xff]  ;;  %2029 = vmatprep.mubr.msk.f32.mxu1 %vm484_vm1, %v2821_v18 }
  0x8c   : > { %2016 = vmatmul.mubr.msk.f32.vlgmr.msra.gmra.mrb[0].mxu0 %vm484_vm1, %v2818_v17  ;;  %p2369_p0 = pneg %p2368_p1 }
  0x8d   : > { %2046 = vmatprep.mubr.msk.f32.mxu0 %vm2492_vm0, %v2493_v1 }
  0x8e   : > { %2030 = vmatmul.mubr.msk.f32.gmra.mrb[2].mxu1 %vm484_vm1, %v2833_v19 }
  0x8f   : > { %2032 = vmatprep.mubr.msk.f32.mxu1 %vm484_vm1, %v2836_v20 }
  0x92   : > { %2033 = vmatmul.mubr.msk.f32.gmra.mrb[4].mxu1 %vm484_vm1, %v2843_v21 }
  0x93   : > { %2035 = vmatprep.mubr.msk.f32.mxu1 %vm484_vm1, %v2846_v22 }
  0x96   : > { %2036 = vmatmul.mubr.msk.f32.gmra.mrb[6].mxu1 %vm484_vm1, %v2853_v23 }
  0x97   : > { %2064 = vmatprep.mubr.msk.f32.mxu1 %vm2492_vm0, %v2493_v1 }
 0x15d   : > { %v2028_v34 = vpop.f32.mrb[0].mxu1 }
 0x15e   : > { %v668_v36 = vpop.f32.mrb[1].mxu1 }
 0x15f   : > { %v570_v30 = vpop.f32.mrb[0].mxu0 }
 0x160   : > { %v708_v31 = vcombine.high %v570_v30, %v570_v30  ;;  %v715_v32 = vrot.slane %v570_v30, %v714_v29  ;;  %v2017_v33 = vpop.f32.mrb[1].mxu0 }
 0x161   : > { %v2031_v43 = vpop.f32.mrb[2].mxu1 }
 0x162   : > { %v722_v37 = vrot.slane %v708_v31, %v714_v29  ;;  %v723_v38 = vcombine.high %v715_v32, %v715_v32  ;;  %v731_v39 = vrot.slane %v715_v32, %v714_v29  ;;  %v678_v45 = vpop.f32.mrb[3].mxu1 }
 0x164   : > { %v724_v40 = vcombine.high %v722_v37, %v722_v37  ;;  %v745_v41 = vrot.slane %v723_v38, %v714_v29  ;;  %v760_v42 = vrot.slane %v731_v39, %v2864_v35  ;;  %v753_v44 = vcombine.high %v731_v39, %v731_v39 }
 0x165   : > { %v738_v46 = vrot.slane %v722_v37, %v714_v29  ;;  %v2034_v57 = vpop.f32.mrb[4].mxu1 }
 0x166   : > { %v764_v47 = vrot.slane %v745_v41, %v2864_v35  ;;  %v797_v48 = vadd.f32 %v760_v42, %v668_v36  ;;  %v755_v49 = vcombine.high %v745_v41, %v745_v41  ;;  %v768_v50 = vrot.slane %v753_v44, %v2864_v35  ;;  %v688_v59 = vpop.f32.mrb[5].mxu1 }
 0x167   : > { %v752_v51 = vrot.slane %v724_v40, %v714_v29  ;;  %v776_v52 = vrot.slane %v738_v46, %v2864_v35  ;;  %v754_v53 = vcombine.high %v738_v46, %v738_v46 }
 0x168   : > { %v798_v54 = vadd.f32 %v2028_v34, %v764_v47  ;;  %2240 = vtanh.f32 %v797_v48  ;;  %v772_v55 = vrot.slane %v755_v49, %v2864_v35  ;;  %v799_v56 = vadd.f32 %v768_v50, %v678_v45 }
 0x169   : > { %v780_v58 = vrot.slane %v752_v51, %v2864_v35  ;;  %v756_v60 = vcombine.high %v752_v51, %v752_v51  ;;  %v801_v62 = vadd.f32 %v776_v52, %v688_v59  ;;  %v2037_v3 = vpop.f32.mrb[6].mxu1  ;;  %v784_v4 = vrot.slane %v754_v53, %v2864_v35 }
 0x16a   : > { %2242 = vtanh.f32 %v798_v54  ;;  %v800_v61 = vadd.f32 %v2031_v43, %v772_v55  ;;  %v698_v6 = vpop.f32.mrb[7].mxu1  ;;  %v861_v45 = vand.u32 127, %v712_v26 }
 0x16b   : > { %2244 = vtanh.f32 %v799_v56  ;;  %v802_v63 = vadd.f32 %v2034_v57, %v780_v58  ;;  %v788_v2 = vrot.slane %v756_v60, %v2864_v35  ;;  %v803_v7 = vadd.f32 %v784_v4, %v698_v6 }
 0x16c   : > { %2246 = vtanh.f32 %v800_v61  ;;  %v2884_v47 = vsub.s32 %v861_v45, %v2860_v28 }
 0x16d   : > { %v804_v5 = vadd.f32 %v2037_v3, %v788_v2  ;;  %2248 = vtanh.f32 %v801_v62 }
 0x16e   : > { %2250 = vtanh.f32 %v802_v63 }
 0x16f   : > { %2252 = vtanh.f32 %v803_v7 }
 0x170   : > { %2254 = vtanh.f32 %v804_v5 }
 0x172   : > { %v2241_v9 = vpop.eup %2240 }
 0x173   : > { %v820_v10 = vmul.f32 %v2241_v9, %v1946_v8  ;;  %v920_v9 = vsub.s32 1, %v2860_v28 }
 0x174   : > { %v2243_v11 = vpop.eup %2242 }
 0x175   : > { %v2245_v12 = vpop.eup %2244  ;;  %v828_v13 = vsel %vm484_vm1, %v820_v10, 0.0  ;;  %v821_v14 = vmul.f32 %v2243_v11, %v1946_v8  ;;  %v924_v10 = vsub.s32 2, %v2860_v28  ;;  %v928_v11 = vsub.s32 3, %v2860_v28 }
 0x176   : > { %v2247_v24 = vpop.eup %2246  ;;  %829 = vadd.xlane.f32.xlu0 %v828_v13  ;;  %v822_v25 = vmul.f32 %v2245_v12, %v1946_v8 }
 0x177   : > { %v2249_v27 = vpop.eup %2248  ;;  %v823_v30 = vmul.f32 %v2247_v24, %v1946_v8  ;;  %v831_v32 = vsel %vm484_vm1, %v821_v14, 0.0 }
 0x178   : > { %v834_v29 = vsel %vm484_vm1, %v822_v25, 0.0  ;;  %v2251_v31 = vpop.eup %2250  ;;  %v824_v33 = vmul.f32 %v2249_v27, %v1946_v8  ;;  %v932_v25 = vsub.s32 4, %v2860_v28 }
 0x179   : > { %835 = vadd.xlane.f32.xlu1 %v834_v29  ;;  %v2253_v34 = vpop.eup %2252  ;;  %v837_v36 = vsel %vm484_vm1, %v823_v30, 0.0  ;;  %v825_v37 = vmul.f32 %v2251_v31, %v1946_v8 }
 0x17a   : > { %832 = vadd.xlane.f32.xlu0 %v831_v32  ;;  %v2255_v38 = vpop.eup %2254  ;;  %v840_v39 = vsel %vm484_vm1, %v824_v33, 0.0  ;;  %v826_v40 = vmul.f32 %v2253_v34, %v1946_v8  ;;  %v936_v34 = vsub.s32 5, %v2860_v28 }
 0x17b   : > { %v843_v41 = vsel %vm484_vm1, %v825_v37, 0.0  ;;  %v827_v42 = vmul.f32 %v2255_v38, %v1946_v8  ;;  %v2495_v8 = vmov 0  }
 0x17c   : > { %v846_v43 = vsel %vm484_vm1, %v826_v40, 0.0  ;;  %2239 = vset.pattern.permute.xlu0 %v2495_v8  ;;  %2238 = vset.pattern.permute.xlu1 %v2495_v8 }
 0x17d   : > { %838 = vadd.xlane.f32.xlu1 %v837_v36  ;;  %v849_v44 = vsel %vm484_vm1, %v827_v42, 0.0 }
 0x17e   : > { %841 = vadd.xlane.f32.xlu0 %v840_v39  ;;  %v940_v39 = vsub.s32 6, %v2860_v28 }
 0x181   : > { %844 = vadd.xlane.f32.xlu1 %v843_v41 }
 0x182   : > { %847 = vadd.xlane.f32.xlu0 %v846_v43  ;;  %v944_v43 = vsub.s32 7, %v2860_v28  ;;  %v1212_v28 = vld [vmem:[%s3169_s5 + $0x28] sm:$0xff] }
 0x185   : > { %850 = vadd.xlane.f32.xlu1 %v849_v44 }
 0x203   : > { %v830_v46 = vpop.xlane.xlu0 %829 }
 0x204   : > { %v865_v50 = vrot.slane %v830_v46, %v2884_v47 }
 0x206   : > { %v836_v48 = vpop.xlane.xlu1 %835 }
 0x207   : > { %v833_v49 = vpop.xlane.xlu0 %832  ;;  %v873_v52 = vrot.slane %v836_v48, %v2884_v47 }
 0x208   : > { %v869_v51 = vrot.slane %v833_v49, %v2884_v47 }
 0x20a   : > { %v895_v53 = vsel %vm894_vm2, %v869_v51, %v865_v50  ;;  %v839_v54 = vpop.xlane.xlu1 %838 }
 0x20b   : > { %v897_v26 = vsel %vm896_vm3, %v873_v52, %v895_v53  ;;  %v877_v55 = vrot.slane %v839_v54, %v2884_v47  ;;  %v842_v56 = vpop.xlane.xlu0 %841 }
 0x20c   : > { %v881_v57 = vrot.slane %v842_v56, %v2884_v47 }
 0x20d   : > { %v899_v58 = vsel %vm898_vm4, %v877_v55, %v897_v26 }
 0x20e   : > { %v901_v59 = vsel %vm900_vm5, %v881_v57, %v899_v58  ;;  %v845_v60 = vpop.xlane.xlu1 %844 }
 0x20f   : > { %v885_v61 = vrot.slane %v845_v60, %v2884_v47  ;;  %v848_v62 = vpop.xlane.xlu0 %847 }
 0x210   : > { %v889_v63 = vrot.slane %v848_v62, %v2884_v47 }
 0x211   : > { %v903_v2 = vsel %vm902_vm6, %v885_v61, %v901_v59 }
 0x212   : > { %v851_v3 = vpop.xlane.xlu1 %850  ;;  %v905_v4 = vsel %vm904_vm7, %v889_v63, %v903_v2 }
 0x213   : > { %v893_v5 = vrot.slane %v851_v3, %v2884_v47 }
 0x215   : > { %v907_v6 = vsel %vm906_vm8, %v893_v5, %v905_v4 }
 0x216   : > { %v910_v7 = vsel %vm909_vm9, %v907_v6, -inf }
 0x217   : > { %911 = vmax.xlane.f32.xlu0 %v910_v7 }
 0x2a4   : > { %v912_v12 = vpop.xlane.xlu0 %911 }
 0x2a5   : > { %v917_v13 = vrot.slane %v912_v12, %v2864_v35  ;;  %v921_v14 = vrot.slane %v912_v12, %v920_v9  ;;  %v925_v24 = vrot.slane %v912_v12, %v924_v10  ;;  %v929_v27 = vrot.slane %v912_v12, %v928_v11 }
 0x2a6   : > { %v933_v36 = vrot.slane %v912_v12, %v932_v25  ;;  %v937_v40 = vrot.slane %v912_v12, %v936_v34  ;;  %v941_v44 = vrot.slane %v912_v12, %v940_v39  ;;  %v945_v50 = vrot.slane %v912_v12, %v944_v43 }
 0x2a7   : > { %v954_v29 = vsub.f32 %v830_v46, %v917_v13  ;;  %v955_v30 = vsub.f32 %v833_v49, %v921_v14  ;;  %v956_v31 = vsub.f32 %v836_v48, %v925_v24  ;;  %v957_v37 = vsub.f32 %v839_v54, %v929_v27 }
 0x2a8   : > { %v958_v41 = vsub.f32 %v842_v56, %v933_v36  ;;  %v959_v45 = vsub.f32 %v845_v60, %v937_v40  ;;  %v960_v51 = vsub.f32 %v848_v62, %v941_v44  ;;  %v961_v54 = vsub.f32 %v851_v3, %v945_v50  ;;  %v1382_v44 = vld [vmem:[%s3169_s5 + $0x40] sm:$0xff] }
 0x2a9   : > { %v962_v32 = vmul.f32 1.442695, %v954_v29  ;;  %v964_v33 = vmul.f32 1.442695, %v955_v30  ;;  %v966_v38 = vmul.f32 1.442695, %v956_v31 }
 0x2aa   : > { %v968_v42 = vmul.f32 1.442695, %v957_v37  ;;  %v970_v46 = vmul.f32 1.442695, %v958_v41  ;;  %v972_v52 = vmul.f32 1.442695, %v959_v45 }
 0x2ab   : > { %2256 = vpow2.f32 %v962_v32  ;;  %v974_v26 = vmul.f32 1.442695, %v960_v51  ;;  %v976_v56 = vmul.f32 1.442695, %v961_v54  ;;  %v1380_v41 = vld [vmem:[%s3169_s5 + $0x30] sm:$0xff]  ;;  %v1383_v45 = vld [vmem:[%s3169_s5 + $0x48] sm:$0xff] }
 0x2ac   : > { %2258 = vpow2.f32 %v964_v33 }
 0x2ad   : > { %2260 = vpow2.f32 %v966_v38 }
 0x2ae   : > { %2262 = vpow2.f32 %v968_v42  ;;  %v1381_v42 = vld [vmem:[%s3169_s5 + $0x38] sm:$0xff] }
 0x2af   : > { %2264 = vpow2.f32 %v970_v46  ;;  %v2123_v46 = vpack.c.bf16 %v1383_v45, %v1382_v44 }
 0x2b0   : > { %2266 = vpow2.f32 %v972_v52 }
 0x2b1   : > { %2268 = vpow2.f32 %v974_v26 }
 0x2b2   : > { %2270 = vpow2.f32 %v976_v56 }
 0x2b5   : > { %v2922_v48 = vpop.eup %2256 }
 0x2b6   : > { %v2924_v49 = vpop.eup %2258  ;;  %987 = vperm.xlu1 %2238, %v2922_v48  }
 0x2b7   : > { %990 = vperm.xlu0 %2239, %v2924_v49   ;;  %v2930_v53 = vpop.eup %2260 }
 0x2b8   : > { %v2933_v55 = vpop.eup %2262 }
 0x2b9   : > { %v2265_v57 = vpop.eup %2264 }
 0x2ba   : > { %993 = vperm.xlu1 %2238, %v2930_v53   ;;  %v2267_v58 = vpop.eup %2266 }
 0x2bb   : > { %v2936_v59 = vpop.eup %2268 }
 0x2bc   : > { %v2939_v60 = vpop.eup %2270 }
 0x2be   : > { %996 = vperm.xlu1 %2238, %v2933_v55  }
 0x2c2   : > { %999 = vperm.xlu1 %2238, %v2265_v57  }
 0x2c6   : > { %1002 = vperm.xlu1 %2238, %v2267_v58  }
 0x2ca   : > { %1005 = vperm.xlu1 %2238, %v2936_v59  }
 0x2ce   : > { %1008 = vperm.xlu1 %2238, %v2939_v60  }
 0x335   : > { %v988_v61 = vpop.permute.xlu1 %987 }
 0x336   : > { %v991_v3 = vpop.permute.xlu0 %990  ;;  %v1013_v6 = vrot.slane %v988_v61, %v2884_v47 }
 0x337   : > { %v1017_v5 = vrot.slane %v991_v3, %v2884_v47 }
 0x339   : > { %v994_v62 = vpop.permute.xlu1 %993  ;;  %v1042_v14 = vsel %vm894_vm2, %v1017_v5, %v1013_v6 }
 0x33a   : > { %v1021_v7 = vrot.slane %v994_v62, %v2884_v47 }
 0x33c   : > { %v1043_v27 = vsel %vm896_vm3, %v1021_v7, %v1042_v14 }
 0x33d   : > { %v997_v63 = vpop.permute.xlu1 %996 }
 0x33e   : > { %v1025_v8 = vrot.slane %v997_v63, %v2884_v47 }
 0x340   : > { %v1044_v30 = vsel %vm898_vm4, %v1025_v8, %v1043_v27 }
 0x341   : > { %v1000_v2 = vpop.permute.xlu1 %999 }
 0x342   : > { %v1029_v12 = vrot.slane %v1000_v2, %v2884_v47 }
 0x344   : > { %v1045_v31 = vsel %vm900_vm5, %v1029_v12, %v1044_v30 }
 0x345   : > { %v1003_v4 = vpop.permute.xlu1 %1002 }
 0x346   : > { %v1033_v24 = vrot.slane %v1003_v4, %v2884_v47 }
 0x348   : > { %v1046_v33 = vsel %vm902_vm6, %v1033_v24, %v1045_v31 }
 0x349   : > { %v1006_v13 = vpop.permute.xlu1 %1005 }
 0x34a   : > { %v1037_v29 = vrot.slane %v1006_v13, %v2884_v47 }
 0x34c   : > { %v1047_v37 = vsel %vm904_vm7, %v1037_v29, %v1046_v33 }
 0x34d   : > { %v1009_v32 = vpop.permute.xlu1 %1008 }
 0x34e   : > { %v1041_v36 = vrot.slane %v1009_v32, %v2884_v47  ;;  %v2120_v47 = vpack.c.bf16 %v1381_v42, %v1380_v41 }
 0x350   : > { %v1048_v38 = vsel %vm906_vm8, %v1041_v36, %v1047_v37  ;;  %2121 = vmatpush3.bf16.msra.mxu1 %v2120_v47 }
 0x351   : > { %v1050_v40 = vsel %vm909_vm9, %v1048_v38, 0.0  ;;  %2122 = vmatprep.subr.bf16.mxu1 %v2491_v0 }
 0x352   : > { %1051 = vadd.xlane.f32.xlu1 %v1050_v40 }
 0x354   : > { %2124 = vmatpush3.bf16.msra.mxu1 %v2123_v46 }
 0x355   : > { %2131 = vmatprep.subr.bf16.mxu1 %v2491_v0 }
 0x357   : > { %2065 = vmatmul.mubr.msk.f32.vlgmr.msra.gmra.mrb[8].mxu1 %vm484_vm1, %v2818_v17 }
 0x358   : > { %2086 = vmatprep.mubr.msk.f32.mxu1 %vm2492_vm0, %v2493_v1 }
 0x3df   : > { %v1052_v50 = vpop.xlane.xlu1 %1051 }
 0x3e0   : > { %2272 = vrcp.f32 %v1052_v50 }
 0x3ea   : > { %v2273_v51 = vpop.eup %2272 }
 0x3eb   : > { %v1058_v52 = vrot.slane %v2273_v51, %v2864_v35  ;;  %v1062_v26 = vrot.slane %v2273_v51, %v920_v9  ;;  %v1066_v61 = vrot.slane %v2273_v51, %v924_v10  ;;  %v1070_v63 = vrot.slane %v2273_v51, %v928_v11 }
 0x3ec   : > { %v1082_v10 = vrot.slane %v2273_v51, %v940_v39  ;;  %v1086_v11 = vrot.slane %v2273_v51, %v944_v43  ;;  %v1211_v39 = vld [vmem:[%s3169_s5 + $0x20] sm:$0xff] }
 0x3ed   : > { %v1095_v54 = vmul.f32 %v2922_v48, %v1058_v52  ;;  %v1096_v56 = vmul.f32 %v2924_v49, %v1062_v26  ;;  %v1097_v62 = vmul.f32 %v2930_v53, %v1066_v61  ;;  %v1098_v35 = vmul.f32 %v2933_v55, %v1070_v63 }
 0x3ee   : > { %v1074_v48 = vrot.slane %v2273_v51, %v932_v25  ;;  %v1078_v49 = vrot.slane %v2273_v51, %v936_v34  ;;  %v1101_v53 = vmul.f32 %v2936_v59, %v1082_v10  ;;  %v1102_v55 = vmul.f32 %v2939_v60, %v1086_v11  ;;  %v1209_v25 = vld [vmem:[%s3169_s5 + $0x10] sm:$0xff]  ;;  %v1210_v34 = vld [vmem:[%s3169_s5 + $0x18] sm:$0xff] }
 0x3ef   : > { %1105 = vperm.xlu0 %2239, %v1095_v54   ;;  %v2114_v43 = vpack.c.bf16 %v1212_v28, %v1211_v39 }
 0x3f0   : > { %v1099_v9 = vmul.f32 %v2265_v57, %v1074_v48  ;;  %v1100_v2 = vmul.f32 %v2267_v58, %v1078_v49  ;;  %v2111_v57 = vpack.c.bf16 %v1210_v34, %v1209_v25  ;;  %v1950_v58 = vld [vmem:[%s3170_s6 + $0x1] ss:$0 sm:$0xff] }
 0x3f2   : > { %2112 = vmatpush3.bf16.msra.mxu0 %v2111_v57 }
 0x3f3   : > { %1110 = vperm.xlu0 %2239, %v1096_v56   ;;  %2113 = vmatprep.subr.bf16.mxu0 %v2491_v0 }
 0x3f6   : > { %2115 = vmatpush3.bf16.msra.mxu0 %v2114_v43 }
 0x3f7   : > { %1115 = vperm.xlu0 %2239, %v1097_v62   ;;  %2116 = vmatprep.subr.bf16.mxu0 %v2491_v0 }
 0x3fb   : > { %1120 = vperm.xlu0 %2239, %v1098_v35  }
 0x3ff   : > { %1125 = vperm.xlu0 %2239, %v1099_v9  }
 0x403   : > { %1130 = vperm.xlu0 %2239, %v1100_v2  }
 0x407   : > { %1135 = vperm.xlu0 %2239, %v1101_v53  }
 0x40b   : > { %1140 = vperm.xlu0 %2239, %v1102_v55  }
 0x42a   : > { %v1455_v59 = vpop.f32.mrb[8].mxu1 }
 0x42b   : > { %v3014_v60 = vadd.f32 %v1950_v58, %v1455_v59  ;;  %v2066_v3 = vpop.f32.mrb[9].mxu1 }
 0x42d   : > { %1467 = vrot.lane.b32.xlu1 %v3014_v60, %s2496_s4 }
 0x46e   : > { %v1106_v4 = vpop.permute.xlu0 %1105 }
 0x46f   : > { %v1143_v8 = vmul.f32 %v1106_v4, %v2808_v15 }
 0x471   : > { %v1151_v27 = vsel %vm484_vm1, %v1143_v8, 0.0 }
 0x472   : > { %v1111_v5 = vpop.permute.xlu0 %1110  ;;  %v1152_v33 = vrot.slane %v1151_v27, 4 }
 0x473   : > { %v1144_v6 = vmul.f32 %v1111_v5, %v2815_v16 }
 0x474   : > { %v1153_v40 = vadd.f32 %v1152_v33, %v1151_v27 }
 0x475   : > { %v1158_v13 = vsel %vm484_vm1, %v1144_v6, 0.0 }
 0x476   : > { %v1116_v7 = vpop.permute.xlu0 %1115  ;;  %v1159_v30 = vrot.slane %v1158_v13, 4  ;;  %v1154_v51 = vrot.slane %v1153_v40, 2 }
 0x477   : > { %v1145_v12 = vmul.f32 %v1116_v7, %v2821_v18 }
 0x478   : > { %v1160_v37 = vadd.f32 %v1159_v30, %v1158_v13  ;;  %v1155_v48 = vadd.f32 %v1154_v51, %v1153_v40  ;;  %v1492_v40 = vld [vmem:[#allocation7 + $0x20] sm:$0xff] }
 0x479   : > { %v1165_v14 = vsel %vm484_vm1, %v1145_v12, 0.0 }
 0x47a   : > { %v1121_v24 = vpop.permute.xlu0 %1120  ;;  %v1166_v31 = vrot.slane %v1165_v14, 4 }
 0x47b   : > { %v1146_v29 = vmul.f32 %v1121_v24, %v2833_v19  ;;  %v1161_v19 = vrot.slane %v1160_v37, 2 }
 0x47c   : > { %v1167_v18 = vadd.f32 %v1166_v31, %v1165_v14  ;;  %v1207_v31 = vld [vmem:[%s3169_s5] sm:$0xff] }
 0x47d   : > { %v1172_v32 = vsel %vm484_vm1, %v1146_v29, 0.0  ;;  %v1162_v61 = vadd.f32 %v1161_v19, %v1160_v37  ;;  %v1494_v19 = vld [vmem:[#allocation7 + $0x30] sm:$0xff] }
 0x47e   : > { %v1173_v16 = vrot.slane %v1172_v32, 4  ;;  %v1126_v36 = vpop.permute.xlu0 %1125  ;;  %v1168_v46 = vrot.slane %v1167_v18, 2 }
 0x47f   : > { %v1147_v15 = vmul.f32 %v1126_v36, %v2836_v20  ;;  %v1163_v11 = vrot.slane %v1162_v61, 1 }
 0x480   : > { %v1174_v41 = vadd.f32 %v1173_v16, %v1172_v32  ;;  %v1169_v63 = vadd.f32 %v1168_v46, %v1167_v18  ;;  %v1208_v32 = vld [vmem:[%s3169_s5 + $0x8] sm:$0xff] }
 0x481   : > { %v1179_v38 = vsel %vm484_vm1, %v1147_v15, 0.0  ;;  %v1164_v59 = vadd.f32 %v1163_v11, %v1162_v61  ;;  %v2117_v18 = vpack.c.bf16 %v1208_v32, %v1207_v31  ;;  %v1489_v11 = vld [vmem:[#allocation7 + $0x8] sm:$0xff] }
 0x482   : > { %v1180_v42 = vrot.slane %v1179_v38, 4  ;;  %v1131_v44 = vpop.permute.xlu0 %1130  ;;  %v1175_v52 = vrot.slane %v1174_v41, 2  ;;  %v1170_v34 = vrot.slane %v1169_v63, 1 }
 0x483   : > { %v1148_v47 = vmul.f32 %v1131_v44, %v2843_v21  ;;  %v486_v44 = vld [vmem:[%s473_s21] sm:$0xff]  ;;  %s2370_s21 = sshll.u32 %s2499_s27, 4  ;;  %s2371_s21 = int_to_ptr.vmem [resolvable:$false] %s2370_s21 }
 0x484   : > { %v1181_v45 = vadd.f32 %v1180_v42, %v1179_v38  ;;  %v1176_v9 = vadd.f32 %v1175_v52, %v1174_v41  ;;  %v1171_v6 = vadd.f32 %v1170_v34, %v1169_v63  ;;  %v1493_v41 = vld [vmem:[#allocation7 + $0x28] sm:$0xff]  ;;  %v1641_v34 = vld [vmem:[#allocation7 + $0x40] sm:$0xff]  ;;  %s2372_s8 = scalar_lea.vmem %s2371_s21, 256  ;;  %p2373_p6 = scmp.lt.s32.totalorder %s1760_s18, %s2371_s21 }
 0x485   : > { %v1186_v50 = vsel %vm484_vm1, %v1148_v47, 0.0  ;;  %v2126_v47 = vpack.c.bf16 %v1493_v41, %v1492_v40  ;;  %p2374_p9 = scmp.lt.s32.totalorder %s2372_s8, %s2366_s28 }
 0x486   : > { %v1187_v54 = vrot.slane %v1186_v50, 4  ;;  %v1136_v26 = vpop.permute.xlu0 %1135  ;;  %v1182_v20 = vrot.slane %v1181_v45, 2  ;;  %v1177_v39 = vrot.slane %v1176_v9, 1 }
 0x487   : > { %v1149_v56 = vmul.f32 %v1136_v26, %v2846_v22  ;;  %v1156_v22 = vrot.slane %v1155_v48, 1  ;;  %p2375_p8 = por %p2374_p9, %p2373_p6 }
 0x488   : > { %v1188_v62 = vadd.f32 %v1187_v54, %v1186_v50  ;;  %v1183_v10 = vadd.f32 %v1182_v20, %v1181_v45  ;;  %v1178_v8 = vadd.f32 %v1177_v39, %v1176_v9  ;;  %v1495_v45 = vld [vmem:[#allocation7 + $0x38] sm:$0xff] }
 0x489   : > { %v1193_v35 = vsel %vm484_vm1, %v1149_v56, 0.0  ;;  %v1157_v7 = vadd.f32 %v1156_v22, %v1155_v48  ;;  %v2129_v46 = vpack.c.bf16 %v1495_v45, %v1494_v19  ;;  %v1949_v54 = vld [vmem:[%s3170_s6] ss:$0 sm:$0xff]  ;;  %p2376_p13 = pnand %p2375_p8, %p2369_p0 }
 0x48a   : > { %v1189_v21 = vrot.slane %v1188_v62, 2  ;;  %v1194_v49 = vrot.slane %v1193_v35, 4  ;;  %v1141_v2 = vpop.permute.xlu0 %1140  ;;  %v1184_v58 = vrot.slane %v1183_v10, 1 }
 0x48b   : > { %v1150_v53 = vmul.f32 %v1141_v2, %v2853_v23  ;;  %v1221_v14 = vsel %vm894_vm2, %v1164_v59, %v1157_v7 }
 0x48c   : > { %v1190_v55 = vadd.f32 %v1189_v21, %v1188_v62  ;;  %v1195_v25 = vadd.f32 %v1194_v49, %v1193_v35  ;;  %v1185_v13 = vadd.f32 %v1184_v58, %v1183_v10  ;;  %v1222_v29 = vsel %vm896_vm3, %v1171_v6, %v1221_v14 }
 0x48d   : > { %v1200_v57 = vsel %vm484_vm1, %v1150_v53, 0.0  ;;  %v1223_v33 = vsel %vm898_vm4, %v1178_v8, %v1222_v29  ;;  %v1488_v53 = vld [vmem:[#allocation7] sm:$0xff] }
 0x48e   : > { %v1196_v28 = vrot.slane %v1195_v25, 2  ;;  %v1201_v43 = vrot.slane %v1200_v57, 4  ;;  %v1191_v3 = vrot.slane %v1190_v55, 1  ;;  %v1224_v36 = vsel %vm900_vm5, %v1185_v13, %v1223_v33 }
 0x490   : > { %v1197_v4 = vadd.f32 %v1196_v28, %v1195_v25  ;;  %v1202_v5 = vadd.f32 %v1201_v43, %v1200_v57  ;;  %v1192_v24 = vadd.f32 %v1191_v3, %v1190_v55  ;;  %v1490_v55 = vld [vmem:[#allocation7 + $0x10] sm:$0xff]  ;;  %v1491_v25 = vld [vmem:[#allocation7 + $0x18] sm:$0xff]  ;;  %v1642_v57 = vld [vmem:[#allocation7 + $0x48] sm:$0xff] }
 0x491   : > { %v2138_v22 = vpack.c.bf16 %v1642_v57, %v1641_v34  ;;  %v2135_v39 = vpack.c.bf16 %v1491_v25, %v1490_v55 }
 0x492   : > { %v1198_v12 = vrot.slane %v1197_v4, 1  ;;  %v1203_v23 = vrot.slane %v1202_v5, 2  ;;  %v1225_v37 = vsel %vm902_vm6, %v1192_v24, %v1224_v36 }
 0x494   : > { %v1204_v27 = vadd.f32 %v1203_v23, %v1202_v5  ;;  %v1199_v30 = vadd.f32 %v1198_v12, %v1197_v4 }
 0x496   : > { %v1205_v16 = vrot.slane %v1204_v27, 1  ;;  %v1226_v38 = vsel %vm904_vm7, %v1199_v30, %v1225_v37 }
 0x498   : > { %v1206_v15 = vadd.f32 %v1205_v16, %v1204_v27 }
 0x49a   : > { %v1227_v42 = vsel %vm906_vm8, %v1206_v15, %v1226_v38 }
 0x49b   : > { %2047 = vmatmul.mubr.msk.f32.vlgmr.msra.gmra.mrb[2].mxu0 %vm484_vm1, %v1227_v42 }
 0x49c   : > { %2118 = vmatpush3.bf16.msra.mxu0 %v2117_v18  ;;  %2053 = vmatprep.mubr.msk.f32.mxu0 %vm2492_vm0, %v2493_v1 }
 0x49d   : > { %2125 = vmatprep.subr.bf16.mxu0 %v2491_v0 }
 0x49f   : > { %2054 = vmatmul.mubr.msk.f32.vlgmr.msra.gmra.mrb[4].mxu0 %vm1300_vm10, %v486_v44 }
 0x4a0   : > { %2127 = vmatpush3.bf16.msra.mxu0 %v2126_v47  ;;  %2075 = vmatprep.mubr.msk.f32.mxu0 %vm2492_vm0, %v2493_v1 }
 0x4a1   : > { %2128 = vmatprep.subr.bf16.mxu0 %v2491_v0 }
 0x4a4   : > { %2130 = vmatpush3.bf16.msra.mxu0 %v2129_v46 }
 0x4a5   : > { %2137 = vmatprep.subr.bf16.mxu0 %v2491_v0 }
 0x4a7   : > { %2076 = vmatmul.mubr.msk.f32.vlgmr.msra.gmra.mrb[6].mxu0 %vm484_vm1, %v1227_v42 }
 0x4a8   : > { %2093 = vmatprep.mubr.msk.f32.mxu0 %vm2492_vm0, %v2493_v1  ;;  %v1468_v1 = vpop.permute.xlu1 %1467  ;;  %2139 = vmatpush3.bf16.msra.mxu0 %v2138_v22 }
 0x4ab   : > { %2094 = vmatmul.mubr.msk.f32.vlgmr.msra.gmra.mrb[8].mxu0 %vm1300_vm10, %v486_v44 }
 0x56e   : > { %v1296_v50 = vpop.f32.mrb[2].mxu0 }
 0x56f   : > { %v2048_v51 = vpop.f32.mrb[3].mxu0 }
 0x572   : > { %v1370_v52 = vpop.f32.mrb[4].mxu0 }
 0x573   : > { %v1371_v26 = vadd.f32 %v1370_v52, %v1296_v50  ;;  %v2055_v20 = vpop.f32.mrb[5].mxu0 }
 0x575   : > { %v1379_v56 = vadd.f32 %v1949_v54, %v1371_v26 }
 0x577   : > { %v1459_v61 = vadd.f32 %v3014_v60, %v1379_v56  ;;  %v2132_v60 = vpack.c.bf16 %v1489_v11, %v1488_v53 }
 0x579   : > { %v1952_v62 = vmul.f32 -1.442695, %v1459_v61  ;;  %2133 = vmatpush3.bf16.msra.mxu1 %v2132_v60 }
 0x57a   : > { %v3068_v63 = vpop.f32.mrb[6].mxu0  ;;  %2134 = vmatprep.subr.bf16.mxu1 %v2491_v0 }
 0x57b   : > { %2274 = vpow2.f32 %v1952_v62  ;;  %v2077_v35 = vpop.f32.mrb[7].mxu0 }
 0x57d   : > { %2136 = vmatpush3.bf16.msra.mxu1 %v2135_v39 }
 0x57e   : > { %v1709_v6 = vpop.f32.mrb[8].mxu0 }
 0x57f   : > { %v2095_v7 = vpop.f32.mrb[9].mxu0 }
 0x585   : > { %v2275_v48 = vpop.eup %2274 }
 0x586   : > { %v1463_v9 = vadd.f32 1.0, %v2275_v48 }
 0x588   : > { %2276 = vrcp.f32 %v1463_v9 }
 0x592   : > { %v2277_v21 = vpop.eup %2276 }
 0x593   : > { %v1470_v49 = vmul.f32 %v2277_v21, %v1468_v1  ;;  %v1477_v58 = vsub.f32 1.0, %v2277_v21 }
 0x595   : > { %1472 = vrot.lane.b32.xlu0 %v1470_v49, %s2496_s4 }
 0x607   : > { %v1473_v2 = vpop.permute.xlu0 %1472 }
 0x608   : > { %v1475_v10 = vadd.f32 %v1473_v2, %v1379_v56 }
 0x60a   : > { %2278 = vtanh.f32 %v1475_v10 }
 0x614   : > { %v2279_v28 = vpop.eup %2278 }
 0x615   : > { %1479 = vrot.lane.b32.xlu0 %v2279_v28, %s2497_s19 }
 0x619   : > { %1483 = vrot.lane.b32.xlu0 %v2818_v17, %s2498_s20 }
 0x687   : > { %v1480_v43 = vpop.permute.xlu0 %1479 }
 0x688   : > { %v1482_v3 = vmul.f32 %v1480_v43, %v1477_v58 }
 0x68b   : > { %v1484_v59 = vpop.permute.xlu0 %1483 }
 0x68c   : > { %v1486_v0 = vmul.f32 %v2277_v21, %v1484_v59 }
 0x68e   : > { %v1487_v4 = vadd.f32 %v1486_v0, %v1482_v3 }
 0x690   : > { %1567 = vrot.lane.b32.xlu0 %v1487_v4, %s2497_s19 }
 0x702   : > { %v1568_v5 = vpop.permute.xlu0 %1567 }
 0x703   : > { %1724 = vst.msk [vmem:[%s2803_s12] sm:$0xff] %vm484_vm1, %v1568_v5  ;;  %2087 = vmatmul.mubr.msk.f32.vlgmr.msra.gmra.mrb[10].mxu1 %vm484_vm1, %v1568_v5 }
 0x704   : > { %2379 = shalt.err (!%p2376_p13)
}
 0x705   : > { %s2380_s12 = scalar_lea.hbm %s3083_s11, 128  ;;  %s2384_s20 = scalar_lea.hbm %s3174_s10, 256 }
 0x706   : > { %p2381_p4 = scmp.ne.s32.totalorder %s3083_s11, %s2380_s12  ;;  %p2385_p12 = scmp.lt.u32.totalorder %s3083_s11, %s3174_s10 }
 0x707   : > { %p2386_p2 = scmp.lt.u32.totalorder %s2384_s20, %s2380_s12  ;;  %p2388_p10 = scmp.lt.u32.totalorder %s2380_s12, %s3083_s11 }
 0x708   : > { %p2382_p5 = pnand %p2381_p4, %p3209_p11 }
 0x709   : > { %p2387_p3 = por %p2386_p2, %p2385_p12 }
 0x70a   : > { %p2383_p7 = pneg %p2382_p5 }
 0x70b   : > { %p2389_p1 = por %p2388_p10, %p2387_p3 }
 0x70d   : > { %p2390_p0 = pnand %p2389_p1, %p2383_p7 }
 0x70f   : > { %2393 = shalt.err (!%p2390_p0)
}
 0x710   : > { %2151 = dma.vmem_to_hbm [thread:$0]  (%p3209_p11), %s1760_s18, 128, %s3083_s11, %s1731_s25  }
 0x711   : > { %s3210_s21 = sld [smem:[#allocation19_spill]]  ;;  %s458_s8 = scalar_lea.vmem [#allocation8], %s1933_s23 }
 0x712   : > { %s1746_s12 = sshll.u32 %s458_s8, 4  ;;  %s3211_s20 = sld [smem:[#allocation20_spill]]  ;;  %s3117_s12 = int_to_ptr.vmem [resolvable:$true] %s1746_s12 }
 0x713   : > { %s1726_s11 = scalar_lea.sflag [#allocation4], %s2749_s29  ;;  %s2394_s18 = scalar_lea.vmem %s3117_s12, 128 }
 0x714   : > { %p2395_p6 = scmp.ne.s32.totalorder %s3117_s12, %s2394_s18  ;;  %s2500_s23 = smov [#allocation8]  }
 0x715   : > { %s2398_s25 = sshll.u32 %s2500_s23, 4  ;;  %s2399_s25 = int_to_ptr.vmem [resolvable:$false] %s2398_s25 }
 0x716   : > { %p2396_p9 = pnand %p2395_p6, %p3209_p11  ;;  %s2400_s16 = scalar_lea.vmem %s2399_s25, 256 }
 0x717   : > { %v1956_v23 = vld [vmem:[%s3210_s21] ss:$0 sm:$0xff]  ;;  %p2401_p13 = scmp.lt.s32.totalorder %s3117_s12, %s2399_s25  ;;  %p2402_p4 = scmp.lt.s32.totalorder %s2400_s16, %s2394_s18 }
 0x718   : > { %s3115_s4 = scalar_lea.hbm %s3211_s20, %s1959_s30  ;;  %p2397_p8 = pneg %p2396_p9 }
 0x719   : > { %p2403_p5 = por %p2402_p4, %p2401_p13 }
 0x71b   : > { %p2404_p7 = pnand %p2403_p5, %p2397_p8 }
 0x7d6   : > { %v1637_v17 = vpop.f32.mrb[10].mxu1 }
 0x7d7   : > { %v1638_v8 = vadd.f32 %v1637_v17, %v3068_v63  ;;  %v2088_v12 = vpop.f32.mrb[11].mxu1 }
 0x7d9   : > { %v1713_v13 = vadd.f32 %v1709_v6, %v1638_v8 }
 0x7db   : > { %v1721_v14 = vadd.f32 %v1956_v23, %v1713_v13 }
 0x7dd   : > { %1722 = vst [vmem:[%s458_s8] sm:$0xff] %v1721_v14 }
 0x7de   : > { %2407 = shalt.err (!%p2404_p7)
}
 0x7df   : > { %s2408_s29 = scalar_lea.hbm %s3115_s4, 128  ;;  %s2412_s28 = scalar_lea.hbm %s3211_s20, 256 }
 0x7e0   : > { %p2409_p12 = scmp.ne.s32.totalorder %s3115_s4, %s2408_s29  ;;  %p2413_p10 = scmp.lt.u32.totalorder %s3115_s4, %s3211_s20 }
 0x7e1   : > { %p2414_p1 = scmp.lt.u32.totalorder %s2412_s28, %s2408_s29  ;;  %p2416_p6 = scmp.lt.u32.totalorder %s2408_s29, %s3115_s4 }
 0x7e2   : > { %p2410_p2 = pnand %p2409_p12, %p3209_p11 }
 0x7e3   : > { %p2415_p0 = por %p2414_p1, %p2413_p10 }
 0x7e4   : > { %p2411_p3 = pneg %p2410_p2 }
 0x7e5   : > { %p2417_p9 = por %p2416_p6, %p2415_p0 }
 0x7e7   : > { %p2418_p8 = pnand %p2417_p9, %p2411_p3 }
 0x7e9   : > { %2421 = shalt.err (!%p2418_p8)
}
 0x7ea   : > { %2150 = dma.vmem_to_hbm [thread:$0]  (%p3209_p11), %s3117_s12, 128, %s3115_s4, %s1726_s11  }
 0x7eb PF: > { %s3212_s8 = sld [smem:[#allocation15_spill]]  ;;  %s3213_s26 = sld [smem:[#allocation17_spill]] }
 0x7ec   : > { %s3214_s19 = sld [smem:[#allocation16_spill]] }
 0x7f1   : > { %s1771_s18 = sand.u32 1, %s3212_s8   ;;  %p3215_p13 = scmp.ne.s32.totalorder %s3213_s26, 0 }
 0x7f2   : > { %p3216_p4 = scmp.ge.s32.totalorder %s3214_s19, 2  ;;  %s1772_s23 = scalar_lea.sflag [#allocation4], %s1771_s18 }
 0x7f4   : > { %p2166_p5 = pnand %p3216_p4, %p3215_p13 }
 0x7f6   : > { %2455 = dma.done.wait (!%p2166_p5), %s1772_s23, 128  }
 0x7f7   : > { %2457 = vsyncadd (!%p2166_p5), %s1772_s23, 4294967168  ;;  %s1781_s25 = scalar_lea.sflag [#allocation10], %s1771_s18 }
 0x7f8   : > { %2459 = dma.done.wait (!%p2166_p5), %s1781_s25, 128  }
 0x7f9   : > { %2461 = vsyncadd (!%p2166_p5), %s1781_s25, 4294967168  ;;  %s31_s18 = sadd.s32 1, %s3214_s19   ;;  %s3217_s24 = smov %s2744_s13 }
 0x7fa   : > { %p28_p7 = scmp.ge.s32.totalorder %s31_s18, 4   ;;  %s3218_s13 = smov %s2468_s14 }
 0x7fb   : > { %s3219_s14 = smov %s2472_s15  ;;  %s3220_s15 = smov %s3217_s24 }
 0x7fc   : > { %s3221_s16 = smov %s2480_s17  ;;  %s3222_s17 = smov %s3224_s22 }
 0x7fd   :  { %30 = sbr.rel (!%p28_p7) target bundleno = 13 (0xd), region = 136 }
 0x804   :  { %1786 = vsyncpa [#allocation3], 1 }
 0x805   :  { %1788 = vsyncpa [#allocation3 + $0x1], 1 }
 0x806   :  { %1789 = vsyncpa [#allocation6], 1 }
 0x807   :  { %1790 = vsyncpa [#allocation4], 1 }
 0x808   :  { %1792 = vsyncpa [#allocation4 + $0x1], 1 }
 0x809   :  { %1793 = vsyncpa [#allocation10], 1 }
 0x80a   :  { %1795 = vsyncpa [#allocation10 + $0x1], 1 }

</bundles_post_ra>
